<compile_context>
chip_gen: v6e
topology: v6e:2x2x1
jax: 0.10.0
libtpu: 0.0.40
codegen_flags: <defaults>
</compile_context>

<pallas_src>
import functools
import math

import jax
import jax.numpy as jnp
from jax import lax
from jax.experimental import pallas as pl
from jax.experimental.pallas import tpu as pltpu


_LANE = 128                     # vreg lane width
_SUBLANE = 8                    # f32 sublane count
_MATMUL_DTYPE = jnp.bfloat16    # MXU operand dtype (accumulation stays f32)
_T_CHUNK_CAP = 16               # max timesteps unrolled per grid step


def _round_up(x, m):
    return (x + m - 1) // m * m


def _lstm_recurrence_kernel(T_total, needs_mask,
                            gx_ref, h0_ref, c0_ref, whh_ref,
                            y_ref, hn_ref, cn_ref,
                            h_sc, c_sc):
    """One (batch-chunk, time-chunk) grid step of the LSTM recurrence.

    gx_ref : (T_CHUNK, B_CHUNK, 4*HP) f32  precomputed x@W_ih^T + b_ih + b_hh
    whh_ref: (HP, 4*HP) bf16               recurrent weights, pre-transposed
    h0/c0  : (B_CHUNK, HP)                 initial state for this batch chunk
    y_ref  : (T_CHUNK, B_CHUNK, HP)
    hn/cn  : (B_CHUNK, HP)                 final state (written on last chunk)
    h_sc/c_sc: (B_CHUNK, HP) f32 scratch   state carried across time chunks
    """
    tc = pl.program_id(1)
    HP = h_sc.shape[-1]
    T_CHUNK = gx_ref.shape[0]

    @pl.when(tc == 0)
    def _():
        h_sc[...] = h0_ref[...].astype(jnp.float32)
        c_sc[...] = c0_ref[...].astype(jnp.float32)

    # Hoist the (loop-invariant) weight read out of the timestep loop.
    whh = whh_ref[...]                                     # (HP, 4*HP) bf16
    t_base = tc * T_CHUNK

    def step(t, carry):
        h, c = carry                                       # f32 (B_CHUNK, HP)
        # Only the recurrent matmul remains on the serial critical path.
        gates = gx_ref[t] + jnp.dot(h.astype(whh.dtype), whh,
                                    preferred_element_type=jnp.float32)
        # PyTorch LSTM gate ordering: input, forget, cell(g), output.
        # HP is a multiple of 128, so these slices are lane-aligned (no XLU).
        i_g = jax.nn.sigmoid(gates[:, 0 * HP:1 * HP])
        f_g = jax.nn.sigmoid(gates[:, 1 * HP:2 * HP])
        g_g = jnp.tanh(gates[:, 2 * HP:3 * HP])
        o_g = jax.nn.sigmoid(gates[:, 3 * HP:4 * HP])
        c_new = f_g * c + i_g * g_g
        h_new = o_g * jnp.tanh(c_new)
        y_ref[t] = h_new.astype(y_ref.dtype)               # lane-dense store
        if needs_mask:
            # Padded (beyond-T) timesteps must not advance the carried state.
            valid = (t_base + t) < T_total
            h_new = jnp.where(valid, h_new, h)
            c_new = jnp.where(valid, c_new, c)
        return h_new, c_new

    h_fin, c_fin = lax.fori_loop(0, T_CHUNK, step,
                                 (h_sc[...], c_sc[...]), unroll=True)
    h_sc[...] = h_fin
    c_sc[...] = c_fin

    @pl.when(tc == pl.num_programs(1) - 1)
    def _():
        hn_ref[...] = h_fin.astype(hn_ref.dtype)
        cn_ref[...] = c_fin.astype(cn_ref.dtype)


@jax.jit
def lstm_forward(x, h0, c0, w_ih, w_hh, b_ih, b_hh):
    """x: (T, B, I); h0, c0: (B, H); w_ih: (4H, I); w_hh: (4H, H); biases: (4H,).

    Returns (y, (h_n, c_n)) matching PyTorch RNNBase with batch_first=False:
    y is (T, B, H); h_n, c_n are (num_layers*num_dirs=1, B, H).
    """
    T, B, I = x.shape
    H = h0.shape[-1]
    f32 = jnp.float32

    # ---- padded internal sizes: lane-aligned hidden/gates, sublane-aligned B.
    HP = _round_up(H, _LANE)
    if B <= _SUBLANE:
        BP, n_bc = _SUBLANE, 1
    else:
        BP = _round_up(B, 2 * _SUBLANE)
        n_bc = 2                      # lets v7x's two TensorCores split the batch
    B_CHUNK = BP // n_bc

    T_CHUNK = min(T, _T_CHUNK_CAP)
    TP = _round_up(T, T_CHUNK)
    n_tc = TP // T_CHUNK
    needs_mask = (TP != T)
    G = 4 * HP

    # ---- re-layout weights with the gate axis padded to HP.  Zero padding is
    #      numerically inert: padded lanes of h / c remain exactly 0.
    wih_g = jnp.pad(w_ih.reshape(4, H, I).astype(f32),
                    ((0, 0), (0, HP - H), (0, 0)))
    whh_g = jnp.pad(w_hh.reshape(4, H, H).astype(f32),
                    ((0, 0), (0, HP - H), (0, HP - H)))
    bias_g = jnp.pad((b_ih + b_hh).reshape(4, H).astype(f32),
                     ((0, 0), (0, HP - H)))

    wih_t = wih_g.transpose(2, 0, 1).reshape(I, G)          # (I, 4*HP)
    whh_t = whh_g.transpose(2, 0, 1).reshape(HP, G)         # (HP, 4*HP)
    bias = bias_g.reshape(1, 1, G)

    # ---- hoist the input projection out of the serial recurrence: one big,
    #      fully-pipelined matmul over all timesteps (handled by XLA).
    x_p = jnp.pad(x.astype(f32), ((0, 0), (0, BP - B), (0, 0)))      # (T, BP, I)
    gx = jnp.einsum('tbi,ig->tbg', x_p, wih_t,
                    precision=jax.lax.Precision.HIGHEST) + bias      # (T, BP, G)
    if needs_mask:
        gx = jnp.pad(gx, ((0, TP - T), (0, 0), (0, 0)))              # (TP, BP, G)

    h0_p = jnp.pad(h0.astype(f32), ((0, BP - B), (0, HP - H)))       # (BP, HP)
    c0_p = jnp.pad(c0.astype(f32), ((0, BP - B), (0, HP - H)))
    whh_bf = whh_t.astype(_MATMUL_DTYPE)                             # bf16 MXU operand

    grid_spec = pltpu.PrefetchScalarGridSpec(
        num_scalar_prefetch=0,
        grid=(n_bc, n_tc),
        in_specs=[
            pl.BlockSpec((T_CHUNK, B_CHUNK, G), lambda bc, tc: (tc, bc, 0)),   # gx
            pl.BlockSpec((B_CHUNK, HP), lambda bc, tc: (bc, 0)),               # h0
            pl.BlockSpec((B_CHUNK, HP), lambda bc, tc: (bc, 0)),               # c0
            # constant index map: W_hh^T stays resident across time chunks
            pl.BlockSpec((HP, G), lambda bc, tc: (0, 0)),                      # W_hh^T
        ],
        out_specs=[
            pl.BlockSpec((T_CHUNK, B_CHUNK, HP), lambda bc, tc: (tc, bc, 0)),  # y
            pl.BlockSpec((B_CHUNK, HP), lambda bc, tc: (bc, 0)),               # h_n
            pl.BlockSpec((B_CHUNK, HP), lambda bc, tc: (bc, 0)),               # c_n
        ],
        scratch_shapes=[
            pltpu.VMEM((B_CHUNK, HP), jnp.float32),   # carried h
            pltpu.VMEM((B_CHUNK, HP), jnp.float32),   # carried c
        ],
    )

    kernel = functools.partial(_lstm_recurrence_kernel, T, needs_mask)

    y_p, hn_p, cn_p = pl.pallas_call(
        kernel,
        out_shape=(
            jax.ShapeDtypeStruct((TP, BP, HP), x.dtype),
            jax.ShapeDtypeStruct((BP, HP), x.dtype),
            jax.ShapeDtypeStruct((BP, HP), x.dtype),
        ),
        grid_spec=grid_spec,
        compiler_params=pltpu.CompilerParams(
            # batch chunks are independent (megacore-shardable); time is serial
            dimension_semantics=("parallel", "arbitrary"),
            vmem_limit_bytes=32 * 1024 * 1024,
        ),
    )(gx, h0_p, c0_p, whh_bf)

    y = y_p[:T, :B, :H]
    hn = hn_p[:B, :H]
    cn = cn_p[:B, :H]
    # Match PyTorch: hidden = (h_n, c_n), each (num_layers*num_dirs, B, H)
    return y, (hn[None], cn[None])


def _reference_lstm(x, h0, c0, w_ih, w_hh, b_ih, b_hh):
    """Pure-JAX (f32) reference with PyTorch LSTM semantics."""
    H = h0.shape[-1]

    def step(carry, x_t):
        h, c = carry
        gates = x_t @ w_ih.T + b_ih + h @ w_hh.T + b_hh
        i = jax.nn.sigmoid(gates[:, 0 * H:1 * H])
        f = jax.nn.sigmoid(gates[:, 1 * H:2 * H])
        g = jnp.tanh(gates[:, 2 * H:3 * H])
        o = jax.nn.sigmoid(gates[:, 3 * H:4 * H])
        c = f * c + i * g
        h = o * jnp.tanh(c)
        return (h, c), h

    (hn, cn), ys = jax.lax.scan(step, (h0, c0), x)
    return ys, (hn[None], cn[None])


if __name__ == "__main__":
    # Small shapes consistent with the module's forward (batch_first=False):
    T, B, INPUT_SIZE, HIDDEN_SIZE = 8, 2, 16, 32

    key = jax.random.PRNGKey(0)
    k_x, k_wih, k_whh, k_bih, k_bhh = jax.random.split(key, 5)

    # reset_parameters(): uniform(-stdv, stdv), stdv = 1/sqrt(hidden_size)
    stdv = 1.0 / math.sqrt(HIDDEN_SIZE)
    gate_size = 4 * HIDDEN_SIZE
    w_ih = jax.random.uniform(k_wih, (gate_size, INPUT_SIZE), jnp.float32, -stdv, stdv)
    w_hh = jax.random.uniform(k_whh, (gate_size, HIDDEN_SIZE), jnp.float32, -stdv, stdv)
    b_ih = jax.random.uniform(k_bih, (gate_size,), jnp.float32, -stdv, stdv)
    b_hh = jax.random.uniform(k_bhh, (gate_size,), jnp.float32, -stdv, stdv)

    x = jax.random.normal(k_x, (T, B, INPUT_SIZE), jnp.float32)
    # forward(): hx defaults to zeros when not supplied
    h0 = jnp.zeros((B, HIDDEN_SIZE), jnp.float32)
    c0 = jnp.zeros((B, HIDDEN_SIZE), jnp.float32)

    y, (hn, cn) = lstm_forward(x, h0, c0, w_ih, w_hh, b_ih, b_hh)
    jax.block_until_ready((y, hn, cn))

    # Correctness check against pure-f32 reference.  The recurrent matmul runs
    # with bf16 operands (f32 accumulation), so tolerance is loosened vs f32.
    y_ref, (hn_ref, cn_ref) = _reference_lstm(x, h0, c0, w_ih, w_hh, b_ih, b_hh)
    assert jnp.allclose(y, y_ref, atol=2e-2, rtol=2e-2)
    assert jnp.allclose(hn, hn_ref, atol=2e-2, rtol=2e-2)
    assert jnp.allclose(cn, cn_ref, atol=2e-2, rtol=2e-2)

    print("KERNEL_OK")
</pallas_src>

<mosaic_0001>
module attributes {stable_mosaic.version = 11 : i64} {
  func.func @_lstm_recurrence_kernel(%arg0: i32, %arg1: i32, %arg2: memref<8x8x512xf32, #tpu.memory_space<vmem>>, %arg3: memref<8x128xf32, #tpu.memory_space<vmem>>, %arg4: memref<8x128xf32, #tpu.memory_space<vmem>>, %arg5: memref<128x512xbf16, #tpu.memory_space<vmem>>, %arg6: memref<8x8x128xf32, #tpu.memory_space<vmem>>, %arg7: memref<8x128xf32, #tpu.memory_space<vmem>>, %arg8: memref<8x128xf32, #tpu.memory_space<vmem>>, %arg9: memref<8x128xf32, #tpu.memory_space<vmem>>, %arg10: memref<8x128xf32, #tpu.memory_space<vmem>>) attributes {dimension_semantics = [#tpu.dimension_semantics<parallel>, #tpu.dimension_semantics<arbitrary>], iteration_bounds = array<i64: 1, 1>, scalar_prefetch = 0 : i64, scratch_operands = 2 : i64, tpu.core_type = #tpu.core_type<tc>, window_params = [{transform_indices = @transform_0, window_bounds = array<i64: 8, 8, 512>}, {transform_indices = @transform_1, window_bounds = array<i64: 8, 128>}, {transform_indices = @transform_2, window_bounds = array<i64: 8, 128>}, {pipeline_mode = #tpu.pipeline_mode<synchronous>, transform_indices = @transform_3, window_bounds = array<i64: 128, 512>}, {transform_indices = @transform_4, window_bounds = array<i64: 8, 8, 128>}, {transform_indices = @transform_5, window_bounds = array<i64: 8, 128>}, {transform_indices = @transform_6, window_bounds = array<i64: 8, 128>}]} {
    %c0_i32 = arith.constant 0 : i32
    %0 = arith.cmpi eq, %arg1, %c0_i32 : i32
    %1 = arith.extui %0 : i1 to i32
    %c0_i32_0 = arith.constant 0 : i32
    %2 = arith.cmpi ne, %1, %c0_i32_0 : i32
    scf.if %2 {
      %c0_76 = arith.constant 0 : index
      %c0_77 = arith.constant 0 : index
      %291 = vector.load %arg3[%c0_76, %c0_77] : memref<8x128xf32, #tpu.memory_space<vmem>>, vector<8x128xf32>
      %c0_78 = arith.constant 0 : index
      %c0_79 = arith.constant 0 : index
      %292 = vector.load %arg9[%c0_78, %c0_79] : memref<8x128xf32, #tpu.memory_space<vmem>>, vector<8x128xf32>
      tpu.vector_store %arg9[%c0_78, %c0_79], %291 {strides = array<i32>} : memref<8x128xf32, #tpu.memory_space<vmem>>, vector<8x128xf32>,
      %c0_80 = arith.constant 0 : index
      %c0_81 = arith.constant 0 : index
      %293 = vector.load %arg4[%c0_80, %c0_81] : memref<8x128xf32, #tpu.memory_space<vmem>>, vector<8x128xf32>
      %c0_82 = arith.constant 0 : index
      %c0_83 = arith.constant 0 : index
      %294 = vector.load %arg10[%c0_82, %c0_83] : memref<8x128xf32, #tpu.memory_space<vmem>>, vector<8x128xf32>
      tpu.vector_store %arg10[%c0_82, %c0_83], %293 {strides = array<i32>} : memref<8x128xf32, #tpu.memory_space<vmem>>, vector<8x128xf32>,
    } else {
    }
    %c0 = arith.constant 0 : index
    %c0_1 = arith.constant 0 : index
    %3 = vector.load %arg5[%c0, %c0_1] : memref<128x512xbf16, #tpu.memory_space<vmem>>, vector<128x512xbf16>
    %c0_2 = arith.constant 0 : index
    %c0_3 = arith.constant 0 : index
    %4 = vector.load %arg9[%c0_2, %c0_3] : memref<8x128xf32, #tpu.memory_space<vmem>>, vector<8x128xf32>
    %c0_4 = arith.constant 0 : index
    %c0_5 = arith.constant 0 : index
    %5 = vector.load %arg10[%c0_4, %c0_5] : memref<8x128xf32, #tpu.memory_space<vmem>>, vector<8x128xf32>
    %c0_i32_6 = arith.constant 0 : i32
    %6 = arith.index_cast %c0_i32_6 : i32 to index
    %c0_7 = arith.constant 0 : index
    %c0_8 = arith.constant 0 : index
    %7 = vector.load %arg2[%6, %c0_7, %c0_8] : memref<8x8x512xf32, #tpu.memory_space<vmem>>, vector<1x8x512xf32>
    %8 = vector.shape_cast %7 : vector<1x8x512xf32> to vector<8x512xf32>
    %9 = arith.truncf %4 : vector<8x128xf32> to vector<8x128xbf16>
    %cst = arith.constant dense<0.000000e+00> : vector<8x512xf32>
    %10 = tpu.matmul %9, %3, %cst {dimension_numbers = #tpu.dot_dimension_numbers<[1], [0], [0], [1], [0, 0, 1, 1], [], []>} : vector<8x128xbf16>, vector<128x512xbf16>, vector<8x512xf32> -> vector<8x512xf32>
    %11 = arith.addf %8, %10 : vector<8x512xf32>
    %12 = vector.extract_strided_slice %11 {offsets = [0, 0], sizes = [8, 128], strides = [1, 1]} : vector<8x512xf32> to vector<8x128xf32>
    %13 = arith.negf %12 : vector<8x128xf32>
    %14 = math.exp %13 : vector<8x128xf32>
    %cst_9 = arith.constant 1.000000e+00 : f32
    %15 = vector.broadcast %cst_9 : f32 to vector<8x128xf32>
    %16 = arith.addf %15, %14 : vector<8x128xf32>
    %17 = arith.divf %15, %16 : vector<8x128xf32>
    %18 = vector.extract_strided_slice %11 {offsets = [0, 128], sizes = [8, 128], strides = [1, 1]} : vector<8x512xf32> to vector<8x128xf32>
    %19 = arith.negf %18 : vector<8x128xf32>
    %20 = math.exp %19 : vector<8x128xf32>
    %cst_10 = arith.constant 1.000000e+00 : f32
    %21 = vector.broadcast %cst_10 : f32 to vector<8x128xf32>
    %22 = arith.addf %21, %20 : vector<8x128xf32>
    %23 = arith.divf %21, %22 : vector<8x128xf32>
    %24 = vector.extract_strided_slice %11 {offsets = [0, 256], sizes = [8, 128], strides = [1, 1]} : vector<8x512xf32> to vector<8x128xf32>
    %25 = math.tanh %24 : vector<8x128xf32>
    %26 = vector.extract_strided_slice %11 {offsets = [0, 384], sizes = [8, 128], strides = [1, 1]} : vector<8x512xf32> to vector<8x128xf32>
    %27 = arith.negf %26 : vector<8x128xf32>
    %28 = math.exp %27 : vector<8x128xf32>
    %cst_11 = arith.constant 1.000000e+00 : f32
    %29 = vector.broadcast %cst_11 : f32 to vector<8x128xf32>
    %30 = arith.addf %29, %28 : vector<8x128xf32>
    %31 = arith.divf %29, %30 : vector<8x128xf32>
    %32 = arith.mulf %23, %5 : vector<8x128xf32>
    %33 = arith.mulf %17, %25 : vector<8x128xf32>
    %34 = arith.addf %32, %33 : vector<8x128xf32>
    %35 = math.tanh %34 : vector<8x128xf32>
    %36 = arith.mulf %31, %35 : vector<8x128xf32>
    %37 = arith.index_cast %c0_i32_6 : i32 to index
    %c0_12 = arith.constant 0 : index
    %c0_13 = arith.constant 0 : index
    %38 = vector.load %arg6[%37, %c0_12, %c0_13] : memref<8x8x128xf32, #tpu.memory_space<vmem>>, vector<1x8x128xf32>
    %39 = vector.shape_cast %38 : vector<1x8x128xf32> to vector<8x128xf32>
    %40 = vector.shape_cast %36 : vector<8x128xf32> to vector<1x8x128xf32>
    tpu.vector_store %arg6[%37, %c0_12, %c0_13], %40 {strides = array<i32>} : memref<8x8x128xf32, #tpu.memory_space<vmem>>, vector<1x8x128xf32>,
    %c1_i32 = arith.constant 1 : i32
    %41 = arith.index_cast %c1_i32 : i32 to index
    %c0_14 = arith.constant 0 : index
    %c0_15 = arith.constant 0 : index
    %42 = vector.load %arg2[%41, %c0_14, %c0_15] : memref<8x8x512xf32, #tpu.memory_space<vmem>>, vector<1x8x512xf32>
    %43 = vector.shape_cast %42 : vector<1x8x512xf32> to vector<8x512xf32>
    %44 = arith.truncf %36 : vector<8x128xf32> to vector<8x128xbf16>
    %cst_16 = arith.constant dense<0.000000e+00> : vector<8x512xf32>
    %45 = tpu.matmul %44, %3, %cst_16 {dimension_numbers = #tpu.dot_dimension_numbers<[1], [0], [0], [1], [0, 0, 1, 1], [], []>} : vector<8x128xbf16>, vector<128x512xbf16>, vector<8x512xf32> -> vector<8x512xf32>
    %46 = arith.addf %43, %45 : vector<8x512xf32>
    %47 = vector.extract_strided_slice %46 {offsets = [0, 0], sizes = [8, 128], strides = [1, 1]} : vector<8x512xf32> to vector<8x128xf32>
    %48 = arith.negf %47 : vector<8x128xf32>
    %49 = math.exp %48 : vector<8x128xf32>
    %cst_17 = arith.constant 1.000000e+00 : f32
    %50 = vector.broadcast %cst_17 : f32 to vector<8x128xf32>
    %51 = arith.addf %50, %49 : vector<8x128xf32>
    %52 = arith.divf %50, %51 : vector<8x128xf32>
    %53 = vector.extract_strided_slice %46 {offsets = [0, 128], sizes = [8, 128], strides = [1, 1]} : vector<8x512xf32> to vector<8x128xf32>
    %54 = arith.negf %53 : vector<8x128xf32>
    %55 = math.exp %54 : vector<8x128xf32>
    %cst_18 = arith.constant 1.000000e+00 : f32
    %56 = vector.broadcast %cst_18 : f32 to vector<8x128xf32>
    %57 = arith.addf %56, %55 : vector<8x128xf32>
    %58 = arith.divf %56, %57 : vector<8x128xf32>
    %59 = vector.extract_strided_slice %46 {offsets = [0, 256], sizes = [8, 128], strides = [1, 1]} : vector<8x512xf32> to vector<8x128xf32>
    %60 = math.tanh %59 : vector<8x128xf32>
    %61 = vector.extract_strided_slice %46 {offsets = [0, 384], sizes = [8, 128], strides = [1, 1]} : vector<8x512xf32> to vector<8x128xf32>
    %62 = arith.negf %61 : vector<8x128xf32>
    %63 = math.exp %62 : vector<8x128xf32>
    %cst_19 = arith.constant 1.000000e+00 : f32
    %64 = vector.broadcast %cst_19 : f32 to vector<8x128xf32>
    %65 = arith.addf %64, %63 : vector<8x128xf32>
    %66 = arith.divf %64, %65 : vector<8x128xf32>
    %67 = arith.mulf %58, %34 : vector<8x128xf32>
    %68 = arith.mulf %52, %60 : vector<8x128xf32>
    %69 = arith.addf %67, %68 : vector<8x128xf32>
    %70 = math.tanh %69 : vector<8x128xf32>
    %71 = arith.mulf %66, %70 : vector<8x128xf32>
    %72 = arith.index_cast %c1_i32 : i32 to index
    %c0_20 = arith.constant 0 : index
    %c0_21 = arith.constant 0 : index
    %73 = vector.load %arg6[%72, %c0_20, %c0_21] : memref<8x8x128xf32, #tpu.memory_space<vmem>>, vector<1x8x128xf32>
    %74 = vector.shape_cast %73 : vector<1x8x128xf32> to vector<8x128xf32>
    %75 = vector.shape_cast %71 : vector<8x128xf32> to vector<1x8x128xf32>
    tpu.vector_store %arg6[%72, %c0_20, %c0_21], %75 {strides = array<i32>} : memref<8x8x128xf32, #tpu.memory_space<vmem>>, vector<1x8x128xf32>,
    %c2_i32 = arith.constant 2 : i32
    %76 = arith.index_cast %c2_i32 : i32 to index
    %c0_22 = arith.constant 0 : index
    %c0_23 = arith.constant 0 : index
    %77 = vector.load %arg2[%76, %c0_22, %c0_23] : memref<8x8x512xf32, #tpu.memory_space<vmem>>, vector<1x8x512xf32>
    %78 = vector.shape_cast %77 : vector<1x8x512xf32> to vector<8x512xf32>
    %79 = arith.truncf %71 : vector<8x128xf32> to vector<8x128xbf16>
    %cst_24 = arith.constant dense<0.000000e+00> : vector<8x512xf32>
    %80 = tpu.matmul %79, %3, %cst_24 {dimension_numbers = #tpu.dot_dimension_numbers<[1], [0], [0], [1], [0, 0, 1, 1], [], []>} : vector<8x128xbf16>, vector<128x512xbf16>, vector<8x512xf32> -> vector<8x512xf32>
    %81 = arith.addf %78, %80 : vector<8x512xf32>
    %82 = vector.extract_strided_slice %81 {offsets = [0, 0], sizes = [8, 128], strides = [1, 1]} : vector<8x512xf32> to vector<8x128xf32>
    %83 = arith.negf %82 : vector<8x128xf32>
    %84 = math.exp %83 : vector<8x128xf32>
    %cst_25 = arith.constant 1.000000e+00 : f32
    %85 = vector.broadcast %cst_25 : f32 to vector<8x128xf32>
    %86 = arith.addf %85, %84 : vector<8x128xf32>
    %87 = arith.divf %85, %86 : vector<8x128xf32>
    %88 = vector.extract_strided_slice %81 {offsets = [0, 128], sizes = [8, 128], strides = [1, 1]} : vector<8x512xf32> to vector<8x128xf32>
    %89 = arith.negf %88 : vector<8x128xf32>
    %90 = math.exp %89 : vector<8x128xf32>
    %cst_26 = arith.constant 1.000000e+00 : f32
    %91 = vector.broadcast %cst_26 : f32 to vector<8x128xf32>
    %92 = arith.addf %91, %90 : vector<8x128xf32>
    %93 = arith.divf %91, %92 : vector<8x128xf32>
    %94 = vector.extract_strided_slice %81 {offsets = [0, 256], sizes = [8, 128], strides = [1, 1]} : vector<8x512xf32> to vector<8x128xf32>
    %95 = math.tanh %94 : vector<8x128xf32>
    %96 = vector.extract_strided_slice %81 {offsets = [0, 384], sizes = [8, 128], strides = [1, 1]} : vector<8x512xf32> to vector<8x128xf32>
    %97 = arith.negf %96 : vector<8x128xf32>
    %98 = math.exp %97 : vector<8x128xf32>
    %cst_27 = arith.constant 1.000000e+00 : f32
    %99 = vector.broadcast %cst_27 : f32 to vector<8x128xf32>
    %100 = arith.addf %99, %98 : vector<8x128xf32>
    %101 = arith.divf %99, %100 : vector<8x128xf32>
    %102 = arith.mulf %93, %69 : vector<8x128xf32>
    %103 = arith.mulf %87, %95 : vector<8x128xf32>
    %104 = arith.addf %102, %103 : vector<8x128xf32>
    %105 = math.tanh %104 : vector<8x128xf32>
    %106 = arith.mulf %101, %105 : vector<8x128xf32>
    %107 = arith.index_cast %c2_i32 : i32 to index
    %c0_28 = arith.constant 0 : index
    %c0_29 = arith.constant 0 : index
    %108 = vector.load %arg6[%107, %c0_28, %c0_29] : memref<8x8x128xf32, #tpu.memory_space<vmem>>, vector<1x8x128xf32>
    %109 = vector.shape_cast %108 : vector<1x8x128xf32> to vector<8x128xf32>
    %110 = vector.shape_cast %106 : vector<8x128xf32> to vector<1x8x128xf32>
    tpu.vector_store %arg6[%107, %c0_28, %c0_29], %110 {strides = array<i32>} : memref<8x8x128xf32, #tpu.memory_space<vmem>>, vector<1x8x128xf32>,
    %c3_i32 = arith.constant 3 : i32
    %111 = arith.index_cast %c3_i32 : i32 to index
    %c0_30 = arith.constant 0 : index
    %c0_31 = arith.constant 0 : index
    %112 = vector.load %arg2[%111, %c0_30, %c0_31] : memref<8x8x512xf32, #tpu.memory_space<vmem>>, vector<1x8x512xf32>
    %113 = vector.shape_cast %112 : vector<1x8x512xf32> to vector<8x512xf32>
    %114 = arith.truncf %106 : vector<8x128xf32> to vector<8x128xbf16>
    %cst_32 = arith.constant dense<0.000000e+00> : vector<8x512xf32>
    %115 = tpu.matmul %114, %3, %cst_32 {dimension_numbers = #tpu.dot_dimension_numbers<[1], [0], [0], [1], [0, 0, 1, 1], [], []>} : vector<8x128xbf16>, vector<128x512xbf16>, vector<8x512xf32> -> vector<8x512xf32>
    %116 = arith.addf %113, %115 : vector<8x512xf32>
    %117 = vector.extract_strided_slice %116 {offsets = [0, 0], sizes = [8, 128], strides = [1, 1]} : vector<8x512xf32> to vector<8x128xf32>
    %118 = arith.negf %117 : vector<8x128xf32>
    %119 = math.exp %118 : vector<8x128xf32>
    %cst_33 = arith.constant 1.000000e+00 : f32
    %120 = vector.broadcast %cst_33 : f32 to vector<8x128xf32>
    %121 = arith.addf %120, %119 : vector<8x128xf32>
    %122 = arith.divf %120, %121 : vector<8x128xf32>
    %123 = vector.extract_strided_slice %116 {offsets = [0, 128], sizes = [8, 128], strides = [1, 1]} : vector<8x512xf32> to vector<8x128xf32>
    %124 = arith.negf %123 : vector<8x128xf32>
    %125 = math.exp %124 : vector<8x128xf32>
    %cst_34 = arith.constant 1.000000e+00 : f32
    %126 = vector.broadcast %cst_34 : f32 to vector<8x128xf32>
    %127 = arith.addf %126, %125 : vector<8x128xf32>
    %128 = arith.divf %126, %127 : vector<8x128xf32>
    %129 = vector.extract_strided_slice %116 {offsets = [0, 256], sizes = [8, 128], strides = [1, 1]} : vector<8x512xf32> to vector<8x128xf32>
    %130 = math.tanh %129 : vector<8x128xf32>
    %131 = vector.extract_strided_slice %116 {offsets = [0, 384], sizes = [8, 128], strides = [1, 1]} : vector<8x512xf32> to vector<8x128xf32>
    %132 = arith.negf %131 : vector<8x128xf32>
    %133 = math.exp %132 : vector<8x128xf32>
    %cst_35 = arith.constant 1.000000e+00 : f32
    %134 = vector.broadcast %cst_35 : f32 to vector<8x128xf32>
    %135 = arith.addf %134, %133 : vector<8x128xf32>
    %136 = arith.divf %134, %135 : vector<8x128xf32>
    %137 = arith.mulf %128, %104 : vector<8x128xf32>
    %138 = arith.mulf %122, %130 : vector<8x128xf32>
    %139 = arith.addf %137, %138 : vector<8x128xf32>
    %140 = math.tanh %139 : vector<8x128xf32>
    %141 = arith.mulf %136, %140 : vector<8x128xf32>
    %142 = arith.index_cast %c3_i32 : i32 to index
    %c0_36 = arith.constant 0 : index
    %c0_37 = arith.constant 0 : index
    %143 = vector.load %arg6[%142, %c0_36, %c0_37] : memref<8x8x128xf32, #tpu.memory_space<vmem>>, vector<1x8x128xf32>
    %144 = vector.shape_cast %143 : vector<1x8x128xf32> to vector<8x128xf32>
    %145 = vector.shape_cast %141 : vector<8x128xf32> to vector<1x8x128xf32>
    tpu.vector_store %arg6[%142, %c0_36, %c0_37], %145 {strides = array<i32>} : memref<8x8x128xf32, #tpu.memory_space<vmem>>, vector<1x8x128xf32>,
    %c4_i32 = arith.constant 4 : i32
    %146 = arith.index_cast %c4_i32 : i32 to index
    %c0_38 = arith.constant 0 : index
    %c0_39 = arith.constant 0 : index
    %147 = vector.load %arg2[%146, %c0_38, %c0_39] : memref<8x8x512xf32, #tpu.memory_space<vmem>>, vector<1x8x512xf32>
    %148 = vector.shape_cast %147 : vector<1x8x512xf32> to vector<8x512xf32>
    %149 = arith.truncf %141 : vector<8x128xf32> to vector<8x128xbf16>
    %cst_40 = arith.constant dense<0.000000e+00> : vector<8x512xf32>
    %150 = tpu.matmul %149, %3, %cst_40 {dimension_numbers = #tpu.dot_dimension_numbers<[1], [0], [0], [1], [0, 0, 1, 1], [], []>} : vector<8x128xbf16>, vector<128x512xbf16>, vector<8x512xf32> -> vector<8x512xf32>
    %151 = arith.addf %148, %150 : vector<8x512xf32>
    %152 = vector.extract_strided_slice %151 {offsets = [0, 0], sizes = [8, 128], strides = [1, 1]} : vector<8x512xf32> to vector<8x128xf32>
    %153 = arith.negf %152 : vector<8x128xf32>
    %154 = math.exp %153 : vector<8x128xf32>
    %cst_41 = arith.constant 1.000000e+00 : f32
    %155 = vector.broadcast %cst_41 : f32 to vector<8x128xf32>
    %156 = arith.addf %155, %154 : vector<8x128xf32>
    %157 = arith.divf %155, %156 : vector<8x128xf32>
    %158 = vector.extract_strided_slice %151 {offsets = [0, 128], sizes = [8, 128], strides = [1, 1]} : vector<8x512xf32> to vector<8x128xf32>
    %159 = arith.negf %158 : vector<8x128xf32>
    %160 = math.exp %159 : vector<8x128xf32>
    %cst_42 = arith.constant 1.000000e+00 : f32
    %161 = vector.broadcast %cst_42 : f32 to vector<8x128xf32>
    %162 = arith.addf %161, %160 : vector<8x128xf32>
    %163 = arith.divf %161, %162 : vector<8x128xf32>
    %164 = vector.extract_strided_slice %151 {offsets = [0, 256], sizes = [8, 128], strides = [1, 1]} : vector<8x512xf32> to vector<8x128xf32>
    %165 = math.tanh %164 : vector<8x128xf32>
    %166 = vector.extract_strided_slice %151 {offsets = [0, 384], sizes = [8, 128], strides = [1, 1]} : vector<8x512xf32> to vector<8x128xf32>
    %167 = arith.negf %166 : vector<8x128xf32>
    %168 = math.exp %167 : vector<8x128xf32>
    %cst_43 = arith.constant 1.000000e+00 : f32
    %169 = vector.broadcast %cst_43 : f32 to vector<8x128xf32>
    %170 = arith.addf %169, %168 : vector<8x128xf32>
    %171 = arith.divf %169, %170 : vector<8x128xf32>
    %172 = arith.mulf %163, %139 : vector<8x128xf32>
    %173 = arith.mulf %157, %165 : vector<8x128xf32>
    %174 = arith.addf %172, %173 : vector<8x128xf32>
    %175 = math.tanh %174 : vector<8x128xf32>
    %176 = arith.mulf %171, %175 : vector<8x128xf32>
    %177 = arith.index_cast %c4_i32 : i32 to index
    %c0_44 = arith.constant 0 : index
    %c0_45 = arith.constant 0 : index
    %178 = vector.load %arg6[%177, %c0_44, %c0_45] : memref<8x8x128xf32, #tpu.memory_space<vmem>>, vector<1x8x128xf32>
    %179 = vector.shape_cast %178 : vector<1x8x128xf32> to vector<8x128xf32>
    %180 = vector.shape_cast %176 : vector<8x128xf32> to vector<1x8x128xf32>
    tpu.vector_store %arg6[%177, %c0_44, %c0_45], %180 {strides = array<i32>} : memref<8x8x128xf32, #tpu.memory_space<vmem>>, vector<1x8x128xf32>,
    %c5_i32 = arith.constant 5 : i32
    %181 = arith.index_cast %c5_i32 : i32 to index
    %c0_46 = arith.constant 0 : index
    %c0_47 = arith.constant 0 : index
    %182 = vector.load %arg2[%181, %c0_46, %c0_47] : memref<8x8x512xf32, #tpu.memory_space<vmem>>, vector<1x8x512xf32>
    %183 = vector.shape_cast %182 : vector<1x8x512xf32> to vector<8x512xf32>
    %184 = arith.truncf %176 : vector<8x128xf32> to vector<8x128xbf16>
    %cst_48 = arith.constant dense<0.000000e+00> : vector<8x512xf32>
    %185 = tpu.matmul %184, %3, %cst_48 {dimension_numbers = #tpu.dot_dimension_numbers<[1], [0], [0], [1], [0, 0, 1, 1], [], []>} : vector<8x128xbf16>, vector<128x512xbf16>, vector<8x512xf32> -> vector<8x512xf32>
    %186 = arith.addf %183, %185 : vector<8x512xf32>
    %187 = vector.extract_strided_slice %186 {offsets = [0, 0], sizes = [8, 128], strides = [1, 1]} : vector<8x512xf32> to vector<8x128xf32>
    %188 = arith.negf %187 : vector<8x128xf32>
    %189 = math.exp %188 : vector<8x128xf32>
    %cst_49 = arith.constant 1.000000e+00 : f32
    %190 = vector.broadcast %cst_49 : f32 to vector<8x128xf32>
    %191 = arith.addf %190, %189 : vector<8x128xf32>
    %192 = arith.divf %190, %191 : vector<8x128xf32>
    %193 = vector.extract_strided_slice %186 {offsets = [0, 128], sizes = [8, 128], strides = [1, 1]} : vector<8x512xf32> to vector<8x128xf32>
    %194 = arith.negf %193 : vector<8x128xf32>
    %195 = math.exp %194 : vector<8x128xf32>
    %cst_50 = arith.constant 1.000000e+00 : f32
    %196 = vector.broadcast %cst_50 : f32 to vector<8x128xf32>
    %197 = arith.addf %196, %195 : vector<8x128xf32>
    %198 = arith.divf %196, %197 : vector<8x128xf32>
    %199 = vector.extract_strided_slice %186 {offsets = [0, 256], sizes = [8, 128], strides = [1, 1]} : vector<8x512xf32> to vector<8x128xf32>
    %200 = math.tanh %199 : vector<8x128xf32>
    %201 = vector.extract_strided_slice %186 {offsets = [0, 384], sizes = [8, 128], strides = [1, 1]} : vector<8x512xf32> to vector<8x128xf32>
    %202 = arith.negf %201 : vector<8x128xf32>
    %203 = math.exp %202 : vector<8x128xf32>
    %cst_51 = arith.constant 1.000000e+00 : f32
    %204 = vector.broadcast %cst_51 : f32 to vector<8x128xf32>
    %205 = arith.addf %204, %203 : vector<8x128xf32>
    %206 = arith.divf %204, %205 : vector<8x128xf32>
    %207 = arith.mulf %198, %174 : vector<8x128xf32>
    %208 = arith.mulf %192, %200 : vector<8x128xf32>
    %209 = arith.addf %207, %208 : vector<8x128xf32>
    %210 = math.tanh %209 : vector<8x128xf32>
    %211 = arith.mulf %206, %210 : vector<8x128xf32>
    %212 = arith.index_cast %c5_i32 : i32 to index
    %c0_52 = arith.constant 0 : index
    %c0_53 = arith.constant 0 : index
    %213 = vector.load %arg6[%212, %c0_52, %c0_53] : memref<8x8x128xf32, #tpu.memory_space<vmem>>, vector<1x8x128xf32>
    %214 = vector.shape_cast %213 : vector<1x8x128xf32> to vector<8x128xf32>
    %215 = vector.shape_cast %211 : vector<8x128xf32> to vector<1x8x128xf32>
    tpu.vector_store %arg6[%212, %c0_52, %c0_53], %215 {strides = array<i32>} : memref<8x8x128xf32, #tpu.memory_space<vmem>>, vector<1x8x128xf32>,
    %c6_i32 = arith.constant 6 : i32
    %216 = arith.index_cast %c6_i32 : i32 to index
    %c0_54 = arith.constant 0 : index
    %c0_55 = arith.constant 0 : index
    %217 = vector.load %arg2[%216, %c0_54, %c0_55] : memref<8x8x512xf32, #tpu.memory_space<vmem>>, vector<1x8x512xf32>
    %218 = vector.shape_cast %217 : vector<1x8x512xf32> to vector<8x512xf32>
    %219 = arith.truncf %211 : vector<8x128xf32> to vector<8x128xbf16>
    %cst_56 = arith.constant dense<0.000000e+00> : vector<8x512xf32>
    %220 = tpu.matmul %219, %3, %cst_56 {dimension_numbers = #tpu.dot_dimension_numbers<[1], [0], [0], [1], [0, 0, 1, 1], [], []>} : vector<8x128xbf16>, vector<128x512xbf16>, vector<8x512xf32> -> vector<8x512xf32>
    %221 = arith.addf %218, %220 : vector<8x512xf32>
    %222 = vector.extract_strided_slice %221 {offsets = [0, 0], sizes = [8, 128], strides = [1, 1]} : vector<8x512xf32> to vector<8x128xf32>
    %223 = arith.negf %222 : vector<8x128xf32>
    %224 = math.exp %223 : vector<8x128xf32>
    %cst_57 = arith.constant 1.000000e+00 : f32
    %225 = vector.broadcast %cst_57 : f32 to vector<8x128xf32>
    %226 = arith.addf %225, %224 : vector<8x128xf32>
    %227 = arith.divf %225, %226 : vector<8x128xf32>
    %228 = vector.extract_strided_slice %221 {offsets = [0, 128], sizes = [8, 128], strides = [1, 1]} : vector<8x512xf32> to vector<8x128xf32>
    %229 = arith.negf %228 : vector<8x128xf32>
    %230 = math.exp %229 : vector<8x128xf32>
    %cst_58 = arith.constant 1.000000e+00 : f32
    %231 = vector.broadcast %cst_58 : f32 to vector<8x128xf32>
    %232 = arith.addf %231, %230 : vector<8x128xf32>
    %233 = arith.divf %231, %232 : vector<8x128xf32>
    %234 = vector.extract_strided_slice %221 {offsets = [0, 256], sizes = [8, 128], strides = [1, 1]} : vector<8x512xf32> to vector<8x128xf32>
    %235 = math.tanh %234 : vector<8x128xf32>
    %236 = vector.extract_strided_slice %221 {offsets = [0, 384], sizes = [8, 128], strides = [1, 1]} : vector<8x512xf32> to vector<8x128xf32>
    %237 = arith.negf %236 : vector<8x128xf32>
    %238 = math.exp %237 : vector<8x128xf32>
    %cst_59 = arith.constant 1.000000e+00 : f32
    %239 = vector.broadcast %cst_59 : f32 to vector<8x128xf32>
    %240 = arith.addf %239, %238 : vector<8x128xf32>
    %241 = arith.divf %239, %240 : vector<8x128xf32>
    %242 = arith.mulf %233, %209 : vector<8x128xf32>
    %243 = arith.mulf %227, %235 : vector<8x128xf32>
    %244 = arith.addf %242, %243 : vector<8x128xf32>
    %245 = math.tanh %244 : vector<8x128xf32>
    %246 = arith.mulf %241, %245 : vector<8x128xf32>
    %247 = arith.index_cast %c6_i32 : i32 to index
    %c0_60 = arith.constant 0 : index
    %c0_61 = arith.constant 0 : index
    %248 = vector.load %arg6[%247, %c0_60, %c0_61] : memref<8x8x128xf32, #tpu.memory_space<vmem>>, vector<1x8x128xf32>
    %249 = vector.shape_cast %248 : vector<1x8x128xf32> to vector<8x128xf32>
    %250 = vector.shape_cast %246 : vector<8x128xf32> to vector<1x8x128xf32>
    tpu.vector_store %arg6[%247, %c0_60, %c0_61], %250 {strides = array<i32>} : memref<8x8x128xf32, #tpu.memory_space<vmem>>, vector<1x8x128xf32>,
    %c7_i32 = arith.constant 7 : i32
    %251 = arith.index_cast %c7_i32 : i32 to index
    %c0_62 = arith.constant 0 : index
    %c0_63 = arith.constant 0 : index
    %252 = vector.load %arg2[%251, %c0_62, %c0_63] : memref<8x8x512xf32, #tpu.memory_space<vmem>>, vector<1x8x512xf32>
    %253 = vector.shape_cast %252 : vector<1x8x512xf32> to vector<8x512xf32>
    %254 = arith.truncf %246 : vector<8x128xf32> to vector<8x128xbf16>
    %cst_64 = arith.constant dense<0.000000e+00> : vector<8x512xf32>
    %255 = tpu.matmul %254, %3, %cst_64 {dimension_numbers = #tpu.dot_dimension_numbers<[1], [0], [0], [1], [0, 0, 1, 1], [], []>} : vector<8x128xbf16>, vector<128x512xbf16>, vector<8x512xf32> -> vector<8x512xf32>
    %256 = arith.addf %253, %255 : vector<8x512xf32>
    %257 = vector.extract_strided_slice %256 {offsets = [0, 0], sizes = [8, 128], strides = [1, 1]} : vector<8x512xf32> to vector<8x128xf32>
    %258 = arith.negf %257 : vector<8x128xf32>
    %259 = math.exp %258 : vector<8x128xf32>
    %cst_65 = arith.constant 1.000000e+00 : f32
    %260 = vector.broadcast %cst_65 : f32 to vector<8x128xf32>
    %261 = arith.addf %260, %259 : vector<8x128xf32>
    %262 = arith.divf %260, %261 : vector<8x128xf32>
    %263 = vector.extract_strided_slice %256 {offsets = [0, 128], sizes = [8, 128], strides = [1, 1]} : vector<8x512xf32> to vector<8x128xf32>
    %264 = arith.negf %263 : vector<8x128xf32>
    %265 = math.exp %264 : vector<8x128xf32>
    %cst_66 = arith.constant 1.000000e+00 : f32
    %266 = vector.broadcast %cst_66 : f32 to vector<8x128xf32>
    %267 = arith.addf %266, %265 : vector<8x128xf32>
    %268 = arith.divf %266, %267 : vector<8x128xf32>
    %269 = vector.extract_strided_slice %256 {offsets = [0, 256], sizes = [8, 128], strides = [1, 1]} : vector<8x512xf32> to vector<8x128xf32>
    %270 = math.tanh %269 : vector<8x128xf32>
    %271 = vector.extract_strided_slice %256 {offsets = [0, 384], sizes = [8, 128], strides = [1, 1]} : vector<8x512xf32> to vector<8x128xf32>
    %272 = arith.negf %271 : vector<8x128xf32>
    %273 = math.exp %272 : vector<8x128xf32>
    %cst_67 = arith.constant 1.000000e+00 : f32
    %274 = vector.broadcast %cst_67 : f32 to vector<8x128xf32>
    %275 = arith.addf %274, %273 : vector<8x128xf32>
    %276 = arith.divf %274, %275 : vector<8x128xf32>
    %277 = arith.mulf %268, %244 : vector<8x128xf32>
    %278 = arith.mulf %262, %270 : vector<8x128xf32>
    %279 = arith.addf %277, %278 : vector<8x128xf32>
    %280 = math.tanh %279 : vector<8x128xf32>
    %281 = arith.mulf %276, %280 : vector<8x128xf32>
    %282 = arith.index_cast %c7_i32 : i32 to index
    %c0_68 = arith.constant 0 : index
    %c0_69 = arith.constant 0 : index
    %283 = vector.load %arg6[%282, %c0_68, %c0_69] : memref<8x8x128xf32, #tpu.memory_space<vmem>>, vector<1x8x128xf32>
    %284 = vector.shape_cast %283 : vector<1x8x128xf32> to vector<8x128xf32>
    %285 = vector.shape_cast %281 : vector<8x128xf32> to vector<1x8x128xf32>
    tpu.vector_store %arg6[%282, %c0_68, %c0_69], %285 {strides = array<i32>} : memref<8x8x128xf32, #tpu.memory_space<vmem>>, vector<1x8x128xf32>,
    %c8_i32 = arith.constant 8 : i32
    %c0_70 = arith.constant 0 : index
    %c0_71 = arith.constant 0 : index
    %286 = vector.load %arg9[%c0_70, %c0_71] : memref<8x128xf32, #tpu.memory_space<vmem>>, vector<8x128xf32>
    tpu.vector_store %arg9[%c0_70, %c0_71], %281 {strides = array<i32>} : memref<8x128xf32, #tpu.memory_space<vmem>>, vector<8x128xf32>,
    %c0_72 = arith.constant 0 : index
    %c0_73 = arith.constant 0 : index
    %287 = vector.load %arg10[%c0_72, %c0_73] : memref<8x128xf32, #tpu.memory_space<vmem>>, vector<8x128xf32>
    tpu.vector_store %arg10[%c0_72, %c0_73], %279 {strides = array<i32>} : memref<8x128xf32, #tpu.memory_space<vmem>>, vector<8x128xf32>,
    %c0_i32_74 = arith.constant 0 : i32
    %288 = arith.cmpi eq, %arg1, %c0_i32_74 : i32
    %289 = arith.extui %288 : i1 to i32
    %c0_i32_75 = arith.constant 0 : i32
    %290 = arith.cmpi ne, %289, %c0_i32_75 : i32
    scf.if %290 {
      %c0_76 = arith.constant 0 : index
      %c0_77 = arith.constant 0 : index
      %291 = vector.load %arg7[%c0_76, %c0_77] : memref<8x128xf32, #tpu.memory_space<vmem>>, vector<8x128xf32>
      tpu.vector_store %arg7[%c0_76, %c0_77], %281 {strides = array<i32>} : memref<8x128xf32, #tpu.memory_space<vmem>>, vector<8x128xf32>,
      %c0_78 = arith.constant 0 : index
      %c0_79 = arith.constant 0 : index
      %292 = vector.load %arg8[%c0_78, %c0_79] : memref<8x128xf32, #tpu.memory_space<vmem>>, vector<8x128xf32>
      tpu.vector_store %arg8[%c0_78, %c0_79], %279 {strides = array<i32>} : memref<8x128xf32, #tpu.memory_space<vmem>>, vector<8x128xf32>,
    } else {
    }
    return
  }
  func.func @transform_0(%arg0: i32, %arg1: i32) -> (i32, i32, i32) {
    %c0_i32 = arith.constant 0 : i32
    %c0_i32_0 = arith.constant 0 : i32
    return %arg1, %arg0, %c0_i32 : i32, i32, i32
  }
  func.func @transform_1(%arg0: i32, %arg1: i32) -> (i32, i32) {
    %c0_i32 = arith.constant 0 : i32
    %c0_i32_0 = arith.constant 0 : i32
    return %arg0, %c0_i32 : i32, i32
  }
  func.func @transform_2(%arg0: i32, %arg1: i32) -> (i32, i32) {
    %c0_i32 = arith.constant 0 : i32
    %c0_i32_0 = arith.constant 0 : i32
    return %arg0, %c0_i32 : i32, i32
  }
  func.func @transform_3(%arg0: i32, %arg1: i32) -> (i32, i32) {
    %c0_i32 = arith.constant 0 : i32
    %c0_i32_0 = arith.constant 0 : i32
    %c0_i32_1 = arith.constant 0 : i32
    return %c0_i32, %c0_i32_0 : i32, i32
  }
  func.func @transform_4(%arg0: i32, %arg1: i32) -> (i32, i32, i32) {
    %c0_i32 = arith.constant 0 : i32
    %c0_i32_0 = arith.constant 0 : i32
    return %arg1, %arg0, %c0_i32 : i32, i32, i32
  }
  func.func @transform_5(%arg0: i32, %arg1: i32) -> (i32, i32) {
    %c0_i32 = arith.constant 0 : i32
    %c0_i32_0 = arith.constant 0 : i32
    return %arg0, %c0_i32 : i32, i32
  }
  func.func @transform_6(%arg0: i32, %arg1: i32) -> (i32, i32) {
    %c0_i32 = arith.constant 0 : i32
    %c0_i32_0 = arith.constant 0 : i32
    return %arg0, %c0_i32 : i32, i32
  }
}

</mosaic_0001>

<bundles_post_ra>
// kernel: lstm_forward.1
= control target key start
LH: loop header
LB: loop body
LE: loop exit
PB: predicated region body
PF: predicated region fallthrough
CT: control target
= control target key end

     0   :  { %v1484_v1 = vmov 0   ;;  %s2172_s3 = inlined_call_operand.vmem [shape: bf16[128,512], index: 3, kind: input, shape index: {}]   ;;  %s2173_s1 = inlined_call_operand.vmem [shape: f32[8,128], index: 1, kind: input, shape index: {}]   ;;  %s2174_s0 = inlined_call_operand.vmem [shape: f32[8,8,512], index: 0, kind: input, shape index: {}]   ;;  %s2175_s2 = inlined_call_operand.vmem [shape: f32[8,128], index: 2, kind: input, shape index: {}]   ;;  %s2176_s4 = inlined_call_operand.vmem [shape: f32[8,8,128], index: 4, kind: output, shape index: {0}]   ;;  %s2177_s6 = inlined_call_operand.vmem [shape: f32[8,128], index: 6, kind: output, shape index: {2}]   ;;  %s2178_s5 = inlined_call_operand.vmem [shape: f32[8,128], index: 5, kind: output, shape index: {1}]  }
   0x1   :  { %v1523_v0 = vld [vmem:[%s2172_s3 + $0xe4] ss:$16 sps:$4 sm:$0xff]   ;;  %260 = vmatprep.mubr.bf16.mxu0 %v1484_v1  ;;  %301 = vmatprep.mubr.bf16.mxu1 %v1484_v1  ;;  %v1530_v2 = vld [vmem:[%s2172_s3 + $0xe0] ss:$16 sps:$4 sm:$0xff]   ;;  %v1553_v6 = vld [vmem:[%s2172_s3 + $0xec] ss:$16 sps:$4 sm:$0xff]  }
   0x2   :  { %228 = vmatprep.subr.bf16.mxu0 %v1523_v0  ;;  %v1536_v3 = vld [vmem:[%s2172_s3 + $0xc4] ss:$16 sps:$4 sm:$0xff]   ;;  %v1542_v4 = vld [vmem:[%s2172_s3 + $0xc0] ss:$16 sps:$4 sm:$0xff]   ;;  %v1558_v7 = vld [vmem:[%s2172_s3 + $0xe8] ss:$16 sps:$4 sm:$0xff]   ;;  %269 = vmatprep.subr.bf16.mxu1 %v1553_v6 }
   0x3   :  { %229 = vmatpush1.bf16.msra.mxu0 %v1530_v2  ;;  %v1548_v5 = vld [vmem:[%s2172_s3 + $0xa4] ss:$16 sps:$4 sm:$0xff]   ;;  %v1564_v8 = vld [vmem:[%s2172_s3 + $0xa0] ss:$16 sps:$4 sm:$0xff]   ;;  %270 = vmatpush1.bf16.msra.mxu1 %v1558_v7  ;;  %v1577_v10 = vld [vmem:[%s2172_s3 + $0xcc] ss:$16 sps:$4 sm:$0xff]  }
   0x4   :  { %230 = vmatprep.subr.bf16.mxu0 %v1536_v3  ;;  %v1571_v9 = vld [vmem:[%s2172_s3 + $0x84] ss:$16 sps:$4 sm:$0xff]   ;;  %v1582_v11 = vld [vmem:[%s2172_s3 + $0xc8] ss:$16 sps:$4 sm:$0xff]   ;;  %271 = vmatprep.subr.bf16.mxu1 %v1577_v10  ;;  %v1589_v12 = vld [vmem:[%s2172_s3 + $0x80] ss:$16 sps:$4 sm:$0xff]  }
   0x5   :  { %v1594_v13 = vld [vmem:[%s2172_s3 + $0x64] ss:$16 sps:$4 sm:$0xff]   ;;  %v1599_v14 = vld [vmem:[%s2172_s3 + $0xac] ss:$16 sps:$4 sm:$0xff]   ;;  %v1606_v15 = vld [vmem:[%s2172_s3 + $0xa8] ss:$16 sps:$4 sm:$0xff]  }
   0x6   :  { %v1612_v16 = vld [vmem:[%s2172_s3 + $0x8c] ss:$16 sps:$4 sm:$0xff]   ;;  %v1618_v17 = vld [vmem:[%s2172_s3 + $0x60] ss:$16 sps:$4 sm:$0xff]   ;;  %v1624_v18 = vld [vmem:[%s2172_s3 + $0x44] ss:$16 sps:$4 sm:$0xff]  }
   0x7   :  { %231 = vmatpush1.bf16.msra.mxu0 %v1542_v4  ;;  %272 = vmatpush1.bf16.msra.mxu1 %v1582_v11  ;;  %v1630_v19 = vld [vmem:[%s2172_s3 + $0x88] ss:$16 sps:$4 sm:$0xff]   ;;  %v1636_v20 = vld [vmem:[%s2172_s3 + $0x6c] ss:$16 sps:$4 sm:$0xff]   ;;  %v1641_v21 = vld [vmem:[%s2172_s3 + $0x40] ss:$16 sps:$4 sm:$0xff]  }
   0x8   :  { %232 = vmatprep.subr.bf16.mxu0 %v1548_v5  ;;  %273 = vmatprep.subr.bf16.mxu1 %v1599_v14  ;;  %v1647_v22 = vld [vmem:[%s2172_s3 + $0x24] ss:$16 sps:$4 sm:$0xff]   ;;  %v1654_v23 = vld [vmem:[%s2172_s3 + $0x68] ss:$16 sps:$4 sm:$0xff]   ;;  %v1660_v24 = vld [vmem:[%s2172_s3 + $0x4c] ss:$16 sps:$4 sm:$0xff]  }
   0x9   :  { %v1666_v25 = vld [vmem:[%s2172_s3 + $0x20] ss:$16 sps:$4 sm:$0xff]   ;;  %v1672_v26 = vld [vmem:[%s2172_s3 + $0x4] ss:$16 sps:$4 sm:$0xff]   ;;  %v1678_v27 = vld [vmem:[%s2172_s3 + $0x48] ss:$16 sps:$4 sm:$0xff]  }
   0xa   :  { %v1684_v28 = vld [vmem:[%s2172_s3 + $0x2c] ss:$16 sps:$4 sm:$0xff]   ;;  %v1690_v29 = vld [vmem:[%s2172_s3] ss:$16 sps:$4 sm:$0xff]   ;;  %v1700_v31 = vld [vmem:[%s2172_s3 + $0x28] ss:$16 sps:$4 sm:$0xff]  }
   0xb   :  { %233 = vmatpush1.bf16.msra.mxu0 %v1564_v8  ;;  %274 = vmatpush1.bf16.msra.mxu1 %v1606_v15  ;;  %v25_v30 = vld [vmem:[%s2173_s1] sm:$0xff]  ;;  %v1706_v32 = vld [vmem:[%s2172_s3 + $0xc] ss:$16 sps:$4 sm:$0xff]   ;;  %v1713_v34 = vld [vmem:[%s2172_s3 + $0x8] ss:$16 sps:$4 sm:$0xff]  }
   0xc   :  { %234 = vmatprep.subr.bf16.mxu0 %v1571_v9  ;;  %275 = vmatprep.subr.bf16.mxu1 %v1612_v16  ;;  %v67_v33 = vpack.c.bf16 %v25_v30, %v25_v30  ;;  %v63_v35 = vld [vmem:[%s2174_s0] sm:$0xff]  ;;  %v64_v37 = vld [vmem:[%s2174_s0 + $0x8] sm:$0xff]  ;;  %v66_v47 = vld [vmem:[%s2174_s0 + $0x18] sm:$0xff] }
   0xd   :  { %v65_v50 = vld [vmem:[%s2174_s0 + $0x10] sm:$0xff]  ;;  %v27_v61 = vld [vmem:[%s2175_s2] sm:$0xff] }
   0xf   :  { %235 = vmatpush1.bf16.msra.mxu0 %v1589_v12  ;;  %276 = vmatpush1.bf16.msra.mxu1 %v1630_v19 }
  0x10   :  { %236 = vmatprep.subr.bf16.mxu0 %v1594_v13  ;;  %277 = vmatprep.subr.bf16.mxu1 %v1636_v20 }
  0x13   :  { %237 = vmatpush1.bf16.msra.mxu0 %v1618_v17  ;;  %278 = vmatpush1.bf16.msra.mxu1 %v1654_v23 }
  0x14   :  { %238 = vmatprep.subr.bf16.mxu0 %v1624_v18  ;;  %279 = vmatprep.subr.bf16.mxu1 %v1660_v24 }
  0x17   :  { %239 = vmatpush1.bf16.msra.mxu0 %v1641_v21  ;;  %280 = vmatpush1.bf16.msra.mxu1 %v1678_v27 }
  0x18   :  { %240 = vmatprep.subr.bf16.mxu0 %v1647_v22  ;;  %281 = vmatprep.subr.bf16.mxu1 %v1684_v28 }
  0x1b   :  { %241 = vmatpush1.bf16.msra.mxu0 %v1666_v25  ;;  %282 = vmatpush1.bf16.msra.mxu1 %v1700_v31 }
  0x1c   :  { %242 = vmatprep.subr.bf16.mxu0 %v1672_v26  ;;  %283 = vmatprep.subr.bf16.mxu1 %v1706_v32 }
  0x1f   :  { %243 = vmatpush1.bf16.msra.mxu0 %v1690_v29  ;;  %284 = vmatpush1.bf16.msra.mxu1 %v1713_v34 }
  0x20   :  { %345 = vmatprep.subr.bf16.mxu0 %v1523_v0  ;;  %386 = vmatprep.subr.bf16.mxu1 %v1553_v6 }
  0x22   :  { %261 = vmatmul.mubr.bf16.vlgmr.msra.gmra.mxu0 %v67_v33  ;;  %302 = vmatmul.mubr.bf16.vlgmr.msra.gmra.mxu1 %v67_v33 }
  0x23   :  { %346 = vmatpush1.bf16.msra.mxu0 %v1530_v2  ;;  %377 = vmatprep.mubr.bf16.mxu0 %v1484_v1 }
  0x24   :  { %347 = vmatprep.subr.bf16.mxu0 %v1536_v3  ;;  %387 = vmatpush1.bf16.msra.mxu1 %v1558_v7 }
  0x25   :  { %388 = vmatprep.subr.bf16.mxu1 %v1577_v10  ;;  %418 = vmatprep.mubr.bf16.mxu1 %v1484_v1 }
  0x27   :  { %348 = vmatpush1.bf16.msra.mxu0 %v1542_v4 }
  0x28   :  { %349 = vmatprep.subr.bf16.mxu0 %v1548_v5  ;;  %389 = vmatpush1.bf16.msra.mxu1 %v1582_v11 }
  0x29   :  { %390 = vmatprep.subr.bf16.mxu1 %v1599_v14 }
  0x2b   :  { %350 = vmatpush1.bf16.msra.mxu0 %v1564_v8 }
  0x2c   :  { %351 = vmatprep.subr.bf16.mxu0 %v1571_v9  ;;  %391 = vmatpush1.bf16.msra.mxu1 %v1606_v15 }
  0x2d   :  { %392 = vmatprep.subr.bf16.mxu1 %v1612_v16 }
  0x2f   :  { %352 = vmatpush1.bf16.msra.mxu0 %v1589_v12 }
  0x30   :  { %353 = vmatprep.subr.bf16.mxu0 %v1594_v13  ;;  %393 = vmatpush1.bf16.msra.mxu1 %v1630_v19 }
  0x31   :  { %394 = vmatprep.subr.bf16.mxu1 %v1636_v20 }
  0x33   :  { %354 = vmatpush1.bf16.msra.mxu0 %v1618_v17 }
  0x34   :  { %355 = vmatprep.subr.bf16.mxu0 %v1624_v18  ;;  %395 = vmatpush1.bf16.msra.mxu1 %v1654_v23 }
  0x35   :  { %396 = vmatprep.subr.bf16.mxu1 %v1660_v24 }
  0x37   :  { %356 = vmatpush1.bf16.msra.mxu0 %v1641_v21 }
  0x38   :  { %357 = vmatprep.subr.bf16.mxu0 %v1647_v22  ;;  %397 = vmatpush1.bf16.msra.mxu1 %v1678_v27 }
  0x39   :  { %398 = vmatprep.subr.bf16.mxu1 %v1684_v28 }
  0x3b   :  { %358 = vmatpush1.bf16.msra.mxu0 %v1666_v25 }
  0x3c   :  { %359 = vmatprep.subr.bf16.mxu0 %v1672_v26  ;;  %399 = vmatpush1.bf16.msra.mxu1 %v1700_v31 }
  0x3d   :  { %400 = vmatprep.subr.bf16.mxu1 %v1706_v32 }
  0x3f   :  { %360 = vmatpush1.bf16.msra.mxu0 %v1690_v29 }
  0x40   :  { %463 = vmatprep.subr.bf16.mxu0 %v1523_v0  ;;  %401 = vmatpush1.bf16.msra.mxu1 %v1713_v34 }
  0x41   :  { %504 = vmatprep.subr.bf16.mxu1 %v1553_v6 }
  0xe2   :  { %v262_v36 = vpop.f32.mrf.mxu0  ;;  %v303_v44 = vpop.f32.mrf.mxu1 }
  0xe3   :  { %v310_v38 = vadd.f32 %v262_v36, %v63_v35  ;;  %v312_v52 = vadd.f32 %v303_v44, %v65_v50 }
  0xe4   :  { %v264_v39 = vpop.f32.mrf.mxu0  ;;  %v305_v46 = vpop.f32.mrf.mxu1 }
  0xe5   :  { %v1216_v40 = vmul.f32 -1.442695, %v310_v38  ;;  %v311_v41 = vadd.f32 %v264_v39, %v64_v37  ;;  %v313_v51 = vadd.f32 %v305_v46, %v66_v47 }
  0xe6   :  { %v266_v42 = vpop.f32.mrf.mxu0  ;;  %v307_v48 = vpop.f32.mrf.mxu1 }
  0xe7   :  { %1324 = vpow2.f32 %v1216_v40  ;;  %v1217_v43 = vmul.f32 -1.442695, %v311_v41  ;;  %v1218_v53 = vmul.f32 -1.442695, %v313_v51  ;;  %v1219_v40 = vld [vmem:[%s2174_s0 + $0x20] sm:$0xff] }
  0xe8   :  { %v267_v45 = vpop.f32.mrf.mxu0  ;;  %v308_v49 = vpop.f32.mrf.mxu1 }
  0xe9   :  { %1326 = vpow2.f32 %v1217_v43  ;;  %v1220_v43 = vld [vmem:[%s2174_s0 + $0x28] sm:$0xff] }
  0xea   :  { %1328 = vtanh.f32 %v312_v52 }
  0xeb   :  { %1330 = vpow2.f32 %v1218_v53 }
  0xf4   :  { %v1325_v54 = vpop.eup %1324 }
  0xf5   :  { %v317_v55 = vadd.f32 1.0, %v1325_v54  ;;  %v1222_v54 = vld [vmem:[%s2174_s0 + $0x38] sm:$0xff] }
  0xf6   :  { %v1327_v56 = vpop.eup %1326 }
  0xf7   :  { %1332 = vrcp.f32 %v317_v55  ;;  %v323_v57 = vadd.f32 1.0, %v1327_v56  ;;  %v1329_v58 = vpop.eup %1328  ;;  %v1221_v56 = vld [vmem:[%s2174_s0 + $0x30] sm:$0xff] }
  0xf8   :  { %v1331_v59 = vpop.eup %1330 }
  0xf9   :  { %1334 = vrcp.f32 %v323_v57  ;;  %v330_v63 = vadd.f32 1.0, %v1331_v59 }
  0xfb   :  { %1336 = vrcp.f32 %v330_v63 }
 0x104   :  { %v1333_v60 = vpop.eup %1332 }
 0x105   :  { %v334_v33 = vmul.f32 %v1333_v60, %v1329_v58 }
 0x106   :  { %v1335_v62 = vpop.eup %1334 }
 0x107   :  { %v333_v30 = vmul.f32 %v1335_v62, %v27_v61 }
 0x108   :  { %v1337_v36 = vpop.eup %1336 }
 0x109   :  { %v1768_v35 = vadd.f32 %v334_v33, %v333_v30 }
 0x10b   :  { %1338 = vtanh.f32 %v1768_v35 }
 0x118   :  { %v1339_v37 = vpop.eup %1338 }
 0x119   :  { %v337_v38 = vmul.f32 %v1339_v37, %v1337_v36 }
 0x11b   :  { %338 = vst [vmem:[%s2176_s4] sm:$0xff] %v337_v38  ;;  %v344_v39 = vpack.c.bf16 %v337_v38, %v337_v38 }
 0x11d   :  { %378 = vmatmul.mubr.bf16.vlgmr.msra.gmra.mxu0 %v344_v39  ;;  %419 = vmatmul.mubr.bf16.vlgmr.msra.gmra.mxu1 %v344_v39 }
 0x11e   :  { %464 = vmatpush1.bf16.msra.mxu0 %v1530_v2  ;;  %505 = vmatpush1.bf16.msra.mxu1 %v1558_v7 }
 0x11f   :  { %465 = vmatprep.subr.bf16.mxu0 %v1536_v3  ;;  %506 = vmatprep.subr.bf16.mxu1 %v1577_v10 }
 0x120   :  { %495 = vmatprep.mubr.bf16.mxu0 %v1484_v1  ;;  %536 = vmatprep.mubr.bf16.mxu1 %v1484_v1 }
 0x122   :  { %466 = vmatpush1.bf16.msra.mxu0 %v1542_v4  ;;  %507 = vmatpush1.bf16.msra.mxu1 %v1582_v11 }
 0x123   :  { %467 = vmatprep.subr.bf16.mxu0 %v1548_v5  ;;  %508 = vmatprep.subr.bf16.mxu1 %v1599_v14 }
 0x126   :  { %468 = vmatpush1.bf16.msra.mxu0 %v1564_v8  ;;  %509 = vmatpush1.bf16.msra.mxu1 %v1606_v15 }
 0x127   :  { %469 = vmatprep.subr.bf16.mxu0 %v1571_v9  ;;  %510 = vmatprep.subr.bf16.mxu1 %v1612_v16 }
 0x12a   :  { %470 = vmatpush1.bf16.msra.mxu0 %v1589_v12  ;;  %511 = vmatpush1.bf16.msra.mxu1 %v1630_v19 }
 0x12b   :  { %471 = vmatprep.subr.bf16.mxu0 %v1594_v13  ;;  %512 = vmatprep.subr.bf16.mxu1 %v1636_v20 }
 0x12e   :  { %472 = vmatpush1.bf16.msra.mxu0 %v1618_v17  ;;  %513 = vmatpush1.bf16.msra.mxu1 %v1654_v23 }
 0x12f   :  { %473 = vmatprep.subr.bf16.mxu0 %v1624_v18  ;;  %514 = vmatprep.subr.bf16.mxu1 %v1660_v24 }
 0x132   :  { %474 = vmatpush1.bf16.msra.mxu0 %v1641_v21  ;;  %515 = vmatpush1.bf16.msra.mxu1 %v1678_v27 }
 0x133   :  { %475 = vmatprep.subr.bf16.mxu0 %v1647_v22  ;;  %516 = vmatprep.subr.bf16.mxu1 %v1684_v28 }
 0x136   :  { %476 = vmatpush1.bf16.msra.mxu0 %v1666_v25  ;;  %517 = vmatpush1.bf16.msra.mxu1 %v1700_v31 }
 0x137   :  { %477 = vmatprep.subr.bf16.mxu0 %v1672_v26  ;;  %518 = vmatprep.subr.bf16.mxu1 %v1706_v32 }
 0x13a   :  { %478 = vmatpush1.bf16.msra.mxu0 %v1690_v29  ;;  %519 = vmatpush1.bf16.msra.mxu1 %v1713_v34 }
 0x13b   :  { %581 = vmatprep.subr.bf16.mxu0 %v1523_v0  ;;  %622 = vmatprep.subr.bf16.mxu1 %v1553_v6 }
 0x1dd   :  { %v379_v41 = vpop.f32.mrf.mxu0  ;;  %v420_v42 = vpop.f32.mrf.mxu1 }
 0x1de   :  { %v427_v44 = vadd.f32 %v1219_v40, %v379_v41  ;;  %v429_v59 = vadd.f32 %v1221_v56, %v420_v42 }
 0x1df   :  { %v381_v45 = vpop.f32.mrf.mxu0  ;;  %v422_v46 = vpop.f32.mrf.mxu1 }
 0x1e0   :  { %v1223_v47 = vmul.f32 -1.442695, %v427_v44  ;;  %v428_v48 = vadd.f32 %v1220_v43, %v381_v45  ;;  %v430_v55 = vadd.f32 %v1222_v54, %v422_v46 }
 0x1e1   :  { %v383_v49 = vpop.f32.mrf.mxu0  ;;  %v424_v50 = vpop.f32.mrf.mxu1 }
 0x1e2   :  { %1340 = vpow2.f32 %v1223_v47  ;;  %v1224_v51 = vmul.f32 -1.442695, %v428_v48  ;;  %v1225_v57 = vmul.f32 -1.442695, %v430_v55  ;;  %v1228_v47 = vld [vmem:[%s2174_s0 + $0x48] sm:$0xff] }
 0x1e3   :  { %v384_v52 = vpop.f32.mrf.mxu0  ;;  %v425_v53 = vpop.f32.mrf.mxu1 }
 0x1e4   :  { %1342 = vpow2.f32 %v1224_v51 }
 0x1e5   :  { %1344 = vpow2.f32 %v1225_v57 }
 0x1ef   :  { %v1341_v58 = vpop.eup %1340 }
 0x1f0   :  { %v434_v60 = vadd.f32 1.0, %v1341_v58  ;;  %v1230_v58 = vld [vmem:[%s2174_s0 + $0x58] sm:$0xff] }
 0x1f1   :  { %v1343_v61 = vpop.eup %1342 }
 0x1f2   :  { %1346 = vrcp.f32 %v434_v60  ;;  %v440_v62 = vadd.f32 1.0, %v1343_v61  ;;  %v1345_v63 = vpop.eup %1344  ;;  %v1229_v60 = vld [vmem:[%s2174_s0 + $0x50] sm:$0xff] }
 0x1f3   :  { %1348 = vtanh.f32 %v429_v59  ;;  %v447_v37 = vadd.f32 1.0, %v1345_v63 }
 0x1f4   :  { %1350 = vrcp.f32 %v440_v62 }
 0x1f5   :  { %1352 = vrcp.f32 %v447_v37 }
 0x1ff   :  { %v1347_v30 = vpop.eup %1346 }
 0x200   :  { %v1349_v33 = vpop.eup %1348 }
 0x201   :  { %v1351_v36 = vpop.eup %1350  ;;  %v451_v38 = vmul.f32 %v1349_v33, %v1347_v30 }
 0x202   :  { %v450_v39 = vmul.f32 %v1351_v36, %v1768_v35  ;;  %v1353_v41 = vpop.eup %1352  ;;  %v1227_v35 = vld [vmem:[%s2174_s0 + $0x40] sm:$0xff] }
 0x204   :  { %v1821_v40 = vadd.f32 %v451_v38, %v450_v39 }
 0x206   :  { %1354 = vtanh.f32 %v1821_v40 }
 0x213   :  { %v1355_v42 = vpop.eup %1354 }
 0x214   :  { %v454_v43 = vmul.f32 %v1355_v42, %v1353_v41 }
 0x216   :  { %1226 = vst [vmem:[%s2176_s4 + $0x8] sm:$0xff] %v454_v43  ;;  %v462_v44 = vpack.c.bf16 %v454_v43, %v454_v43 }
 0x218   :  { %496 = vmatmul.mubr.bf16.vlgmr.msra.gmra.mxu0 %v462_v44  ;;  %537 = vmatmul.mubr.bf16.vlgmr.msra.gmra.mxu1 %v462_v44 }
 0x219   :  { %582 = vmatpush1.bf16.msra.mxu0 %v1530_v2  ;;  %623 = vmatpush1.bf16.msra.mxu1 %v1558_v7 }
 0x21a   :  { %583 = vmatprep.subr.bf16.mxu0 %v1536_v3  ;;  %624 = vmatprep.subr.bf16.mxu1 %v1577_v10 }
 0x21b   :  { %613 = vmatprep.mubr.bf16.mxu0 %v1484_v1  ;;  %654 = vmatprep.mubr.bf16.mxu1 %v1484_v1 }
 0x21d   :  { %584 = vmatpush1.bf16.msra.mxu0 %v1542_v4  ;;  %625 = vmatpush1.bf16.msra.mxu1 %v1582_v11 }
 0x21e   :  { %585 = vmatprep.subr.bf16.mxu0 %v1548_v5  ;;  %626 = vmatprep.subr.bf16.mxu1 %v1599_v14 }
 0x221   :  { %586 = vmatpush1.bf16.msra.mxu0 %v1564_v8  ;;  %627 = vmatpush1.bf16.msra.mxu1 %v1606_v15 }
 0x222   :  { %587 = vmatprep.subr.bf16.mxu0 %v1571_v9  ;;  %628 = vmatprep.subr.bf16.mxu1 %v1612_v16 }
 0x225   :  { %588 = vmatpush1.bf16.msra.mxu0 %v1589_v12  ;;  %629 = vmatpush1.bf16.msra.mxu1 %v1630_v19 }
 0x226   :  { %589 = vmatprep.subr.bf16.mxu0 %v1594_v13  ;;  %630 = vmatprep.subr.bf16.mxu1 %v1636_v20 }
 0x229   :  { %590 = vmatpush1.bf16.msra.mxu0 %v1618_v17  ;;  %631 = vmatpush1.bf16.msra.mxu1 %v1654_v23 }
 0x22a   :  { %591 = vmatprep.subr.bf16.mxu0 %v1624_v18  ;;  %632 = vmatprep.subr.bf16.mxu1 %v1660_v24 }
 0x22d   :  { %592 = vmatpush1.bf16.msra.mxu0 %v1641_v21  ;;  %633 = vmatpush1.bf16.msra.mxu1 %v1678_v27 }
 0x22e   :  { %593 = vmatprep.subr.bf16.mxu0 %v1647_v22  ;;  %634 = vmatprep.subr.bf16.mxu1 %v1684_v28 }
 0x231   :  { %594 = vmatpush1.bf16.msra.mxu0 %v1666_v25  ;;  %635 = vmatpush1.bf16.msra.mxu1 %v1700_v31 }
 0x232   :  { %595 = vmatprep.subr.bf16.mxu0 %v1672_v26  ;;  %636 = vmatprep.subr.bf16.mxu1 %v1706_v32 }
 0x235   :  { %596 = vmatpush1.bf16.msra.mxu0 %v1690_v29  ;;  %637 = vmatpush1.bf16.msra.mxu1 %v1713_v34 }
 0x236   :  { %699 = vmatprep.subr.bf16.mxu0 %v1523_v0  ;;  %740 = vmatprep.subr.bf16.mxu1 %v1553_v6 }
 0x2d8   :  { %v497_v45 = vpop.f32.mrf.mxu0  ;;  %v538_v46 = vpop.f32.mrf.mxu1 }
 0x2d9   :  { %v545_v48 = vadd.f32 %v1227_v35, %v497_v45  ;;  %v547_v63 = vadd.f32 %v1229_v60, %v538_v46 }
 0x2da   :  { %v499_v49 = vpop.f32.mrf.mxu0  ;;  %v540_v50 = vpop.f32.mrf.mxu1 }
 0x2db   :  { %v1231_v51 = vmul.f32 -1.442695, %v545_v48  ;;  %v546_v52 = vadd.f32 %v1228_v47, %v499_v49  ;;  %v548_v59 = vadd.f32 %v1230_v58, %v540_v50 }
 0x2dc   :  { %v501_v53 = vpop.f32.mrf.mxu0  ;;  %v542_v54 = vpop.f32.mrf.mxu1 }
 0x2dd   :  { %1356 = vpow2.f32 %v1231_v51  ;;  %v1232_v55 = vmul.f32 -1.442695, %v546_v52  ;;  %v1233_v61 = vmul.f32 -1.442695, %v548_v59  ;;  %v1236_v51 = vld [vmem:[%s2174_s0 + $0x68] sm:$0xff] }
 0x2de   :  { %v502_v56 = vpop.f32.mrf.mxu0  ;;  %v543_v57 = vpop.f32.mrf.mxu1 }
 0x2df   :  { %1358 = vpow2.f32 %v1232_v55 }
 0x2e0   :  { %1360 = vpow2.f32 %v1233_v61 }
 0x2ea   :  { %v1357_v62 = vpop.eup %1356 }
 0x2eb   :  { %v552_v30 = vadd.f32 1.0, %v1357_v62  ;;  %v1238_v62 = vld [vmem:[%s2174_s0 + $0x78] sm:$0xff] }
 0x2ec   :  { %v1359_v33 = vpop.eup %1358 }
 0x2ed   :  { %1362 = vrcp.f32 %v552_v30  ;;  %v558_v36 = vadd.f32 1.0, %v1359_v33  ;;  %v1361_v37 = vpop.eup %1360  ;;  %v1237_v30 = vld [vmem:[%s2174_s0 + $0x70] sm:$0xff] }
 0x2ee   :  { %1364 = vtanh.f32 %v547_v63  ;;  %v565_v42 = vadd.f32 1.0, %v1361_v37 }
 0x2ef   :  { %1366 = vrcp.f32 %v558_v36 }
 0x2f0   :  { %1368 = vrcp.f32 %v565_v42 }
 0x2fa   :  { %v1363_v38 = vpop.eup %1362 }
 0x2fb   :  { %v1365_v39 = vpop.eup %1364 }
 0x2fc   :  { %v1367_v41 = vpop.eup %1366  ;;  %v569_v43 = vmul.f32 %v1365_v39, %v1363_v38 }
 0x2fd   :  { %v568_v44 = vmul.f32 %v1367_v41, %v1821_v40  ;;  %v1369_v45 = vpop.eup %1368  ;;  %v1235_v40 = vld [vmem:[%s2174_s0 + $0x60] sm:$0xff] }
 0x2ff   :  { %v1874_v35 = vadd.f32 %v569_v43, %v568_v44 }
 0x301   :  { %1370 = vtanh.f32 %v1874_v35 }
 0x30e   :  { %v1371_v46 = vpop.eup %1370 }
 0x30f   :  { %v572_v47 = vmul.f32 %v1371_v46, %v1369_v45 }
 0x311   :  { %1234 = vst [vmem:[%s2176_s4 + $0x10] sm:$0xff] %v572_v47  ;;  %v580_v48 = vpack.c.bf16 %v572_v47, %v572_v47 }
 0x313   :  { %614 = vmatmul.mubr.bf16.vlgmr.msra.gmra.mxu0 %v580_v48  ;;  %655 = vmatmul.mubr.bf16.vlgmr.msra.gmra.mxu1 %v580_v48 }
 0x314   :  { %700 = vmatpush1.bf16.msra.mxu0 %v1530_v2  ;;  %741 = vmatpush1.bf16.msra.mxu1 %v1558_v7 }
 0x315   :  { %701 = vmatprep.subr.bf16.mxu0 %v1536_v3  ;;  %742 = vmatprep.subr.bf16.mxu1 %v1577_v10 }
 0x316   :  { %731 = vmatprep.mubr.bf16.mxu0 %v1484_v1  ;;  %772 = vmatprep.mubr.bf16.mxu1 %v1484_v1 }
 0x318   :  { %702 = vmatpush1.bf16.msra.mxu0 %v1542_v4  ;;  %743 = vmatpush1.bf16.msra.mxu1 %v1582_v11 }
 0x319   :  { %703 = vmatprep.subr.bf16.mxu0 %v1548_v5  ;;  %744 = vmatprep.subr.bf16.mxu1 %v1599_v14 }
 0x31c   :  { %704 = vmatpush1.bf16.msra.mxu0 %v1564_v8  ;;  %745 = vmatpush1.bf16.msra.mxu1 %v1606_v15 }
 0x31d   :  { %705 = vmatprep.subr.bf16.mxu0 %v1571_v9  ;;  %746 = vmatprep.subr.bf16.mxu1 %v1612_v16 }
 0x320   :  { %706 = vmatpush1.bf16.msra.mxu0 %v1589_v12  ;;  %747 = vmatpush1.bf16.msra.mxu1 %v1630_v19 }
 0x321   :  { %707 = vmatprep.subr.bf16.mxu0 %v1594_v13  ;;  %748 = vmatprep.subr.bf16.mxu1 %v1636_v20 }
 0x324   :  { %708 = vmatpush1.bf16.msra.mxu0 %v1618_v17  ;;  %749 = vmatpush1.bf16.msra.mxu1 %v1654_v23 }
 0x325   :  { %709 = vmatprep.subr.bf16.mxu0 %v1624_v18  ;;  %750 = vmatprep.subr.bf16.mxu1 %v1660_v24 }
 0x328   :  { %710 = vmatpush1.bf16.msra.mxu0 %v1641_v21  ;;  %751 = vmatpush1.bf16.msra.mxu1 %v1678_v27 }
 0x329   :  { %711 = vmatprep.subr.bf16.mxu0 %v1647_v22  ;;  %752 = vmatprep.subr.bf16.mxu1 %v1684_v28 }
 0x32c   :  { %712 = vmatpush1.bf16.msra.mxu0 %v1666_v25  ;;  %753 = vmatpush1.bf16.msra.mxu1 %v1700_v31 }
 0x32d   :  { %713 = vmatprep.subr.bf16.mxu0 %v1672_v26  ;;  %754 = vmatprep.subr.bf16.mxu1 %v1706_v32 }
 0x330   :  { %714 = vmatpush1.bf16.msra.mxu0 %v1690_v29  ;;  %755 = vmatpush1.bf16.msra.mxu1 %v1713_v34 }
 0x331   :  { %817 = vmatprep.subr.bf16.mxu0 %v1523_v0  ;;  %858 = vmatprep.subr.bf16.mxu1 %v1553_v6 }
 0x3d3   :  { %v615_v49 = vpop.f32.mrf.mxu0  ;;  %v656_v50 = vpop.f32.mrf.mxu1 }
 0x3d4   :  { %v663_v52 = vadd.f32 %v1235_v40, %v615_v49  ;;  %v665_v37 = vadd.f32 %v1237_v30, %v656_v50  ;;  %v1246_v30 = vld [vmem:[%s2174_s0 + $0x98] sm:$0xff] }
 0x3d5   :  { %v617_v53 = vpop.f32.mrf.mxu0  ;;  %v658_v54 = vpop.f32.mrf.mxu1 }
 0x3d6   :  { %v1239_v55 = vmul.f32 -1.442695, %v663_v52  ;;  %v664_v56 = vadd.f32 %v1236_v51, %v617_v53  ;;  %v666_v63 = vadd.f32 %v1238_v62, %v658_v54 }
 0x3d7   :  { %v619_v57 = vpop.f32.mrf.mxu0  ;;  %v660_v58 = vpop.f32.mrf.mxu1 }
 0x3d8   :  { %1372 = vpow2.f32 %v1239_v55  ;;  %v1240_v59 = vmul.f32 -1.442695, %v664_v56  ;;  %v1241_v33 = vmul.f32 -1.442695, %v666_v63  ;;  %v1244_v55 = vld [vmem:[%s2174_s0 + $0x88] sm:$0xff] }
 0x3d9   :  { %v620_v60 = vpop.f32.mrf.mxu0  ;;  %v661_v61 = vpop.f32.mrf.mxu1 }
 0x3da   :  { %1374 = vpow2.f32 %v1240_v59 }
 0x3db   :  { %1376 = vpow2.f32 %v1241_v33 }
 0x3e5   :  { %v1373_v36 = vpop.eup %1372 }
 0x3e6   :  { %v670_v38 = vadd.f32 1.0, %v1373_v36  ;;  %v1245_v36 = vld [vmem:[%s2174_s0 + $0x90] sm:$0xff] }
 0x3e7   :  { %v1375_v39 = vpop.eup %1374 }
 0x3e8   :  { %1378 = vrcp.f32 %v670_v38  ;;  %v676_v41 = vadd.f32 1.0, %v1375_v39  ;;  %v1377_v42 = vpop.eup %1376 }
 0x3e9   :  { %1380 = vtanh.f32 %v665_v37  ;;  %v683_v46 = vadd.f32 1.0, %v1377_v42 }
 0x3ea   :  { %1382 = vrcp.f32 %v676_v41 }
 0x3eb   :  { %1384 = vrcp.f32 %v683_v46 }
 0x3f5   :  { %v1379_v43 = vpop.eup %1378 }
 0x3f6   :  { %v1381_v44 = vpop.eup %1380 }
 0x3f7   :  { %v1383_v45 = vpop.eup %1382  ;;  %v687_v47 = vmul.f32 %v1381_v44, %v1379_v43 }
 0x3f8   :  { %v686_v48 = vmul.f32 %v1383_v45, %v1874_v35  ;;  %v1385_v49 = vpop.eup %1384  ;;  %v1243_v35 = vld [vmem:[%s2174_s0 + $0x80] sm:$0xff] }
 0x3fa   :  { %v1927_v40 = vadd.f32 %v687_v47, %v686_v48 }
 0x3fc   :  { %1386 = vtanh.f32 %v1927_v40 }
 0x409   :  { %v1387_v50 = vpop.eup %1386 }
 0x40a   :  { %v690_v51 = vmul.f32 %v1387_v50, %v1385_v49 }
 0x40c   :  { %1242 = vst [vmem:[%s2176_s4 + $0x18] sm:$0xff] %v690_v51  ;;  %v698_v52 = vpack.c.bf16 %v690_v51, %v690_v51 }
 0x40e   :  { %732 = vmatmul.mubr.bf16.vlgmr.msra.gmra.mxu0 %v698_v52  ;;  %773 = vmatmul.mubr.bf16.vlgmr.msra.gmra.mxu1 %v698_v52 }
 0x40f   :  { %818 = vmatpush1.bf16.msra.mxu0 %v1530_v2  ;;  %859 = vmatpush1.bf16.msra.mxu1 %v1558_v7 }
 0x410   :  { %819 = vmatprep.subr.bf16.mxu0 %v1536_v3  ;;  %860 = vmatprep.subr.bf16.mxu1 %v1577_v10 }
 0x411   :  { %849 = vmatprep.mubr.bf16.mxu0 %v1484_v1  ;;  %890 = vmatprep.mubr.bf16.mxu1 %v1484_v1 }
 0x413   :  { %820 = vmatpush1.bf16.msra.mxu0 %v1542_v4  ;;  %861 = vmatpush1.bf16.msra.mxu1 %v1582_v11 }
 0x414   :  { %821 = vmatprep.subr.bf16.mxu0 %v1548_v5  ;;  %862 = vmatprep.subr.bf16.mxu1 %v1599_v14 }
 0x417   :  { %822 = vmatpush1.bf16.msra.mxu0 %v1564_v8  ;;  %863 = vmatpush1.bf16.msra.mxu1 %v1606_v15 }
 0x418   :  { %823 = vmatprep.subr.bf16.mxu0 %v1571_v9  ;;  %864 = vmatprep.subr.bf16.mxu1 %v1612_v16 }
 0x41b   :  { %824 = vmatpush1.bf16.msra.mxu0 %v1589_v12  ;;  %865 = vmatpush1.bf16.msra.mxu1 %v1630_v19 }
 0x41c   :  { %825 = vmatprep.subr.bf16.mxu0 %v1594_v13  ;;  %866 = vmatprep.subr.bf16.mxu1 %v1636_v20 }
 0x41f   :  { %826 = vmatpush1.bf16.msra.mxu0 %v1618_v17  ;;  %867 = vmatpush1.bf16.msra.mxu1 %v1654_v23 }
 0x420   :  { %827 = vmatprep.subr.bf16.mxu0 %v1624_v18  ;;  %868 = vmatprep.subr.bf16.mxu1 %v1660_v24 }
 0x423   :  { %828 = vmatpush1.bf16.msra.mxu0 %v1641_v21  ;;  %869 = vmatpush1.bf16.msra.mxu1 %v1678_v27 }
 0x424   :  { %829 = vmatprep.subr.bf16.mxu0 %v1647_v22  ;;  %870 = vmatprep.subr.bf16.mxu1 %v1684_v28 }
 0x427   :  { %830 = vmatpush1.bf16.msra.mxu0 %v1666_v25  ;;  %871 = vmatpush1.bf16.msra.mxu1 %v1700_v31 }
 0x428   :  { %831 = vmatprep.subr.bf16.mxu0 %v1672_v26  ;;  %872 = vmatprep.subr.bf16.mxu1 %v1706_v32 }
 0x42b   :  { %832 = vmatpush1.bf16.msra.mxu0 %v1690_v29  ;;  %873 = vmatpush1.bf16.msra.mxu1 %v1713_v34 }
 0x42c   :  { %935 = vmatprep.subr.bf16.mxu0 %v1523_v0  ;;  %976 = vmatprep.subr.bf16.mxu1 %v1553_v6 }
 0x4ce   :  { %v733_v53 = vpop.f32.mrf.mxu0  ;;  %v774_v54 = vpop.f32.mrf.mxu1 }
 0x4cf   :  { %v781_v56 = vadd.f32 %v1243_v35, %v733_v53  ;;  %v783_v39 = vadd.f32 %v1245_v36, %v774_v54  ;;  %v1461_v36 = vld [vmem:[%s2172_s3 + $0xac] ss:$16 sps:$4 sm:$0xff]  }
 0x4d0   :  { %v735_v57 = vpop.f32.mrf.mxu0  ;;  %v776_v58 = vpop.f32.mrf.mxu1 }
 0x4d1   :  { %v1247_v59 = vmul.f32 -1.442695, %v781_v56  ;;  %v782_v60 = vadd.f32 %v1244_v55, %v735_v57  ;;  %v784_v33 = vadd.f32 %v1246_v30, %v776_v58  ;;  %v1459_v30 = vld [vmem:[%s2172_s3 + $0xc8] ss:$16 sps:$4 sm:$0xff]  }
 0x4d2   :  { %v737_v61 = vpop.f32.mrf.mxu0  ;;  %v778_v62 = vpop.f32.mrf.mxu1 }
 0x4d3   :  { %1388 = vpow2.f32 %v1247_v59  ;;  %v1248_v0 = vmul.f32 -1.442695, %v782_v60  ;;  %v1249_v37 = vmul.f32 -1.442695, %v784_v33  ;;  %v1454_v61 = vld [vmem:[%s2172_s3 + $0xe0] ss:$16 sps:$4 sm:$0xff]  }
 0x4d4   :  { %v738_v6 = vpop.f32.mrf.mxu0  ;;  %v779_v63 = vpop.f32.mrf.mxu1  ;;  %v1455_v62 = vld [vmem:[%s2172_s3 + $0xe8] ss:$16 sps:$4 sm:$0xff]   ;;  %v1460_v33 = vld [vmem:[%s2172_s3 + $0xa4] ss:$16 sps:$4 sm:$0xff]  }
 0x4d5   :  { %1390 = vpow2.f32 %v1248_v0  ;;  %v1456_v0 = vld [vmem:[%s2172_s3 + $0xc4] ss:$16 sps:$4 sm:$0xff]   ;;  %v1457_v6 = vld [vmem:[%s2172_s3 + $0xcc] ss:$16 sps:$4 sm:$0xff]   ;;  %v1458_v63 = vld [vmem:[%s2172_s3 + $0xc0] ss:$16 sps:$4 sm:$0xff]  }
 0x4d6   :  { %1392 = vpow2.f32 %v1249_v37  ;;  %v1463_v37 = vld [vmem:[%s2172_s3 + $0xa8] ss:$16 sps:$4 sm:$0xff]  }
 0x4e0   :  { %v1389_v38 = vpop.eup %1388 }
 0x4e1   :  { %v788_v41 = vadd.f32 1.0, %v1389_v38  ;;  %v1464_v38 = vld [vmem:[%s2172_s3 + $0x84] ss:$16 sps:$4 sm:$0xff]  }
 0x4e2   :  { %v1391_v42 = vpop.eup %1390 }
 0x4e3   :  { %1394 = vrcp.f32 %v788_v41  ;;  %v794_v43 = vadd.f32 1.0, %v1391_v42  ;;  %v1393_v44 = vpop.eup %1392  ;;  %v1466_v41 = vld [vmem:[%s2172_s3 + $0x80] ss:$16 sps:$4 sm:$0xff]   ;;  %v1467_v42 = vld [vmem:[%s2172_s3 + $0x88] ss:$16 sps:$4 sm:$0xff]  }
 0x4e4   :  { %1396 = vtanh.f32 %v783_v39  ;;  %v801_v48 = vadd.f32 1.0, %v1393_v44  ;;  %v1465_v39 = vld [vmem:[%s2172_s3 + $0x8c] ss:$16 sps:$4 sm:$0xff]  }
 0x4e5   :  { %1398 = vrcp.f32 %v794_v43  ;;  %v1468_v43 = vld [vmem:[%s2172_s3 + $0x64] ss:$16 sps:$4 sm:$0xff]   ;;  %v1469_v44 = vld [vmem:[%s2172_s3 + $0x6c] ss:$16 sps:$4 sm:$0xff]  }
 0x4e6   :  { %1400 = vrcp.f32 %v801_v48  ;;  %v1473_v48 = vld [vmem:[%s2172_s3 + $0x4c] ss:$16 sps:$4 sm:$0xff]  }
 0x4f0   :  { %v1395_v45 = vpop.eup %1394 }
 0x4f1   :  { %v1397_v46 = vpop.eup %1396 }
 0x4f2   :  { %v1399_v47 = vpop.eup %1398  ;;  %v805_v49 = vmul.f32 %v1397_v46, %v1395_v45  ;;  %v1470_v45 = vld [vmem:[%s2172_s3 + $0x60] ss:$16 sps:$4 sm:$0xff]   ;;  %v1471_v46 = vld [vmem:[%s2172_s3 + $0x68] ss:$16 sps:$4 sm:$0xff]  }
 0x4f3   :  { %v804_v50 = vmul.f32 %v1399_v47, %v1927_v40  ;;  %v1401_v52 = vpop.eup %1400  ;;  %v1472_v47 = vld [vmem:[%s2172_s3 + $0x44] ss:$16 sps:$4 sm:$0xff]  }
 0x4f5   :  { %v1980_v51 = vadd.f32 %v805_v49, %v804_v50  ;;  %v1474_v49 = vld [vmem:[%s2172_s3 + $0x40] ss:$16 sps:$4 sm:$0xff]   ;;  %v1475_v50 = vld [vmem:[%s2172_s3 + $0x48] ss:$16 sps:$4 sm:$0xff]  }
 0x4f7   :  { %1402 = vtanh.f32 %v1980_v51 }
 0x504   :  { %v1403_v35 = vpop.eup %1402 }
 0x505   :  { %v808_v53 = vmul.f32 %v1403_v35, %v1401_v52  ;;  %v1477_v52 = vld [vmem:[%s2172_s3 + $0x2c] ss:$16 sps:$4 sm:$0xff]   ;;  %v1478_v35 = vld [vmem:[%s2172_s3 + $0x20] ss:$16 sps:$4 sm:$0xff]  }
 0x507   :  { %1250 = vst [vmem:[%s2176_s4 + $0x20] sm:$0xff] %v808_v53  ;;  %v816_v54 = vpack.c.bf16 %v808_v53, %v808_v53  ;;  %v1479_v53 = vld [vmem:[%s2172_s3 + $0x28] ss:$16 sps:$4 sm:$0xff]  }
 0x509   :  { %850 = vmatmul.mubr.bf16.vlgmr.msra.gmra.mxu0 %v816_v54  ;;  %891 = vmatmul.mubr.bf16.vlgmr.msra.gmra.mxu1 %v816_v54  ;;  %v1480_v54 = vld [vmem:[%s2172_s3 + $0x4] ss:$16 sps:$4 sm:$0xff]  }
 0x50a   :  { %936 = vmatpush1.bf16.msra.mxu0 %v1530_v2  ;;  %977 = vmatpush1.bf16.msra.mxu1 %v1558_v7  ;;  %v1452_v2 = vld [vmem:[%s2172_s3 + $0xe4] ss:$16 sps:$4 sm:$0xff]  }
 0x50b   :  { %937 = vmatprep.subr.bf16.mxu0 %v1536_v3  ;;  %978 = vmatprep.subr.bf16.mxu1 %v1577_v10  ;;  %v1453_v3 = vld [vmem:[%s2172_s3 + $0xec] ss:$16 sps:$4 sm:$0xff]  }
 0x50c   :  { %967 = vmatprep.mubr.bf16.mxu0 %v1484_v1  ;;  %1008 = vmatprep.mubr.bf16.mxu1 %v1484_v1 }
 0x50e   :  { %938 = vmatpush1.bf16.msra.mxu0 %v1542_v4  ;;  %979 = vmatpush1.bf16.msra.mxu1 %v1582_v11  ;;  %v1251_v4 = vld [vmem:[%s2174_s0 + $0xa0] sm:$0xff] }
 0x50f   :  { %939 = vmatprep.subr.bf16.mxu0 %v1548_v5  ;;  %980 = vmatprep.subr.bf16.mxu1 %v1599_v14 }
 0x512   :  { %940 = vmatpush1.bf16.msra.mxu0 %v1564_v8  ;;  %981 = vmatpush1.bf16.msra.mxu1 %v1606_v15  ;;  %v1252_v8 = vld [vmem:[%s2174_s0 + $0xa8] sm:$0xff] }
 0x513   :  { %941 = vmatprep.subr.bf16.mxu0 %v1571_v9  ;;  %982 = vmatprep.subr.bf16.mxu1 %v1612_v16 }
 0x516   :  { %942 = vmatpush1.bf16.msra.mxu0 %v1589_v12  ;;  %983 = vmatpush1.bf16.msra.mxu1 %v1630_v19  ;;  %v1254_v19 = vld [vmem:[%s2174_s0 + $0xb8] sm:$0xff] }
 0x517   :  { %943 = vmatprep.subr.bf16.mxu0 %v1594_v13  ;;  %984 = vmatprep.subr.bf16.mxu1 %v1636_v20 }
 0x51a   :  { %944 = vmatpush1.bf16.msra.mxu0 %v1618_v17  ;;  %985 = vmatpush1.bf16.msra.mxu1 %v1654_v23 }
 0x51b   :  { %945 = vmatprep.subr.bf16.mxu0 %v1624_v18  ;;  %986 = vmatprep.subr.bf16.mxu1 %v1660_v24 }
 0x51e   :  { %946 = vmatpush1.bf16.msra.mxu0 %v1641_v21  ;;  %987 = vmatpush1.bf16.msra.mxu1 %v1678_v27  ;;  %v1253_v21 = vld [vmem:[%s2174_s0 + $0xb0] sm:$0xff] }
 0x51f   :  { %947 = vmatprep.subr.bf16.mxu0 %v1647_v22  ;;  %988 = vmatprep.subr.bf16.mxu1 %v1684_v28 }
 0x522   :  { %948 = vmatpush1.bf16.msra.mxu0 %v1666_v25  ;;  %989 = vmatpush1.bf16.msra.mxu1 %v1700_v31 }
 0x523   :  { %949 = vmatprep.subr.bf16.mxu0 %v1672_v26  ;;  %990 = vmatprep.subr.bf16.mxu1 %v1706_v32 }
 0x526   :  { %950 = vmatpush1.bf16.msra.mxu0 %v1690_v29  ;;  %991 = vmatpush1.bf16.msra.mxu1 %v1713_v34 }
 0x527   :  { %1053 = vmatprep.subr.bf16.mxu0 %v1452_v2  ;;  %1094 = vmatprep.subr.bf16.mxu1 %v1453_v3  ;;  %v1481_v2 = vld [vmem:[%s2172_s3 + $0xc] ss:$16 sps:$4 sm:$0xff]   ;;  %v1482_v3 = vld [vmem:[%s2172_s3] ss:$16 sps:$4 sm:$0xff]  }
 0x5c9   :  { %v851_v5 = vpop.f32.mrf.mxu0  ;;  %v892_v7 = vpop.f32.mrf.mxu1 }
 0x5ca   :  { %v899_v9 = vadd.f32 %v1251_v4, %v851_v5  ;;  %v901_v24 = vadd.f32 %v1253_v21, %v892_v7  ;;  %v1483_v4 = vld [vmem:[%s2172_s3 + $0x8] ss:$16 sps:$4 sm:$0xff]   ;;  %v1259_v5 = vld [vmem:[%s2174_s0 + $0xc0] sm:$0xff] }
 0x5cb   :  { %v853_v10 = vpop.f32.mrf.mxu0  ;;  %v894_v11 = vpop.f32.mrf.mxu1 }
 0x5cc   :  { %v1255_v12 = vmul.f32 -1.442695, %v899_v9  ;;  %v900_v13 = vadd.f32 %v1252_v8, %v853_v10  ;;  %v902_v20 = vadd.f32 %v1254_v19, %v894_v11  ;;  %v1260_v9 = vld [vmem:[%s2174_s0 + $0xc8] sm:$0xff] }
 0x5cd   :  { %v855_v14 = vpop.f32.mrf.mxu0  ;;  %v896_v15 = vpop.f32.mrf.mxu1 }
 0x5ce   :  { %1404 = vpow2.f32 %v1255_v12  ;;  %v1256_v16 = vmul.f32 -1.442695, %v900_v13  ;;  %v1257_v22 = vmul.f32 -1.442695, %v902_v20  ;;  %v1262_v20 = vld [vmem:[%s2174_s0 + $0xd8] sm:$0xff] }
 0x5cf   :  { %v856_v17 = vpop.f32.mrf.mxu0  ;;  %v897_v18 = vpop.f32.mrf.mxu1 }
 0x5d0   :  { %1406 = vpow2.f32 %v1256_v16 }
 0x5d1   :  { %1408 = vpow2.f32 %v1257_v22  ;;  %v1261_v22 = vld [vmem:[%s2174_s0 + $0xd0] sm:$0xff] }
 0x5db   :  { %v1405_v23 = vpop.eup %1404 }
 0x5dc   :  { %v906_v25 = vadd.f32 1.0, %v1405_v23 }
 0x5dd   :  { %v1407_v26 = vpop.eup %1406 }
 0x5de   :  { %1410 = vrcp.f32 %v906_v25  ;;  %v912_v27 = vadd.f32 1.0, %v1407_v26  ;;  %v1409_v28 = vpop.eup %1408 }
 0x5df   :  { %1412 = vtanh.f32 %v901_v24  ;;  %v919_v34 = vadd.f32 1.0, %v1409_v28 }
 0x5e0   :  { %1414 = vrcp.f32 %v912_v27 }
 0x5e1   :  { %1416 = vrcp.f32 %v919_v34 }
 0x5eb   :  { %v1411_v29 = vpop.eup %1410 }
 0x5ec   :  { %v1413_v31 = vpop.eup %1412 }
 0x5ed   :  { %v1415_v32 = vpop.eup %1414  ;;  %v923_v40 = vmul.f32 %v1413_v31, %v1411_v29 }
 0x5ee   :  { %v922_v55 = vmul.f32 %v1415_v32, %v1980_v51  ;;  %v1417_v57 = vpop.eup %1416  ;;  %v1476_v51 = vld [vmem:[%s2172_s3 + $0x24] ss:$16 sps:$4 sm:$0xff]  }
 0x5f0   :  { %v2037_v56 = vadd.f32 %v923_v40, %v922_v55 }
 0x5f2   :  { %1418 = vtanh.f32 %v2037_v56 }
 0x5ff   :  { %v1419_v58 = vpop.eup %1418 }
 0x600   :  { %v926_v59 = vmul.f32 %v1419_v58, %v1417_v57 }
 0x602   :  { %1258 = vst [vmem:[%s2176_s4 + $0x28] sm:$0xff] %v926_v59  ;;  %v934_v60 = vpack.c.bf16 %v926_v59, %v926_v59 }
 0x604   :  { %968 = vmatmul.mubr.bf16.vlgmr.msra.gmra.mxu0 %v934_v60  ;;  %1009 = vmatmul.mubr.bf16.vlgmr.msra.gmra.mxu1 %v934_v60 }
 0x605   :  { %1054 = vmatpush1.bf16.msra.mxu0 %v1454_v61  ;;  %1095 = vmatpush1.bf16.msra.mxu1 %v1455_v62 }
 0x606   :  { %1055 = vmatprep.subr.bf16.mxu0 %v1456_v0  ;;  %1096 = vmatprep.subr.bf16.mxu1 %v1457_v6  ;;  %v1267_v0 = vld [vmem:[%s2174_s0 + $0xe0] sm:$0xff] }
 0x607   :  { %1085 = vmatprep.mubr.bf16.mxu0 %v1484_v1  ;;  %1126 = vmatprep.mubr.bf16.mxu1 %v1484_v1  ;;  %v1462_v1 = vld [vmem:[%s2172_s3 + $0xa0] ss:$16 sps:$4 sm:$0xff]  }
 0x609   :  { %1056 = vmatpush1.bf16.msra.mxu0 %v1458_v63  ;;  %1097 = vmatpush1.bf16.msra.mxu1 %v1459_v30 }
 0x60a   :  { %1057 = vmatprep.subr.bf16.mxu0 %v1460_v33  ;;  %1098 = vmatprep.subr.bf16.mxu1 %v1461_v36 }
 0x60d   :  { %1058 = vmatpush1.bf16.msra.mxu0 %v1462_v1  ;;  %1099 = vmatpush1.bf16.msra.mxu1 %v1463_v37 }
 0x60e   :  { %1059 = vmatprep.subr.bf16.mxu0 %v1464_v38  ;;  %1100 = vmatprep.subr.bf16.mxu1 %v1465_v39 }
 0x611   :  { %1060 = vmatpush1.bf16.msra.mxu0 %v1466_v41  ;;  %1101 = vmatpush1.bf16.msra.mxu1 %v1467_v42 }
 0x612   :  { %1061 = vmatprep.subr.bf16.mxu0 %v1468_v43  ;;  %1102 = vmatprep.subr.bf16.mxu1 %v1469_v44  ;;  %v1270_v44 = vld [vmem:[%s2174_s0 + $0xf8] sm:$0xff] }
 0x615   :  { %1062 = vmatpush1.bf16.msra.mxu0 %v1470_v45  ;;  %1103 = vmatpush1.bf16.msra.mxu1 %v1471_v46  ;;  %v1269_v46 = vld [vmem:[%s2174_s0 + $0xf0] sm:$0xff] }
 0x616   :  { %1063 = vmatprep.subr.bf16.mxu0 %v1472_v47  ;;  %1104 = vmatprep.subr.bf16.mxu1 %v1473_v48 }
 0x619   :  { %1064 = vmatpush1.bf16.msra.mxu0 %v1474_v49  ;;  %1105 = vmatpush1.bf16.msra.mxu1 %v1475_v50 }
 0x61a   :  { %1065 = vmatprep.subr.bf16.mxu0 %v1476_v51  ;;  %1106 = vmatprep.subr.bf16.mxu1 %v1477_v52 }
 0x61d   :  { %1066 = vmatpush1.bf16.msra.mxu0 %v1478_v35  ;;  %1107 = vmatpush1.bf16.msra.mxu1 %v1479_v53 }
 0x61e   :  { %1067 = vmatprep.subr.bf16.mxu0 %v1480_v54  ;;  %1108 = vmatprep.subr.bf16.mxu1 %v1481_v2 }
 0x621   :  { %1068 = vmatpush1.bf16.msra.mxu0 %v1482_v3  ;;  %1109 = vmatpush1.bf16.msra.mxu1 %v1483_v4 }
 0x6c4   :  { %v969_v7 = vpop.f32.mrf.mxu0  ;;  %v1010_v8 = vpop.f32.mrf.mxu1 }
 0x6c5   :  { %v1017_v10 = vadd.f32 %v1259_v5, %v969_v7  ;;  %v1019_v25 = vadd.f32 %v1261_v22, %v1010_v8 }
 0x6c6   :  { %v971_v11 = vpop.f32.mrf.mxu0  ;;  %v1012_v12 = vpop.f32.mrf.mxu1 }
 0x6c7   :  { %v1263_v13 = vmul.f32 -1.442695, %v1017_v10  ;;  %v1018_v14 = vadd.f32 %v1260_v9, %v971_v11  ;;  %v1020_v21 = vadd.f32 %v1262_v20, %v1012_v12 }
 0x6c8   :  { %v973_v15 = vpop.f32.mrf.mxu0  ;;  %v1014_v16 = vpop.f32.mrf.mxu1 }
 0x6c9   :  { %1420 = vpow2.f32 %v1263_v13  ;;  %v1264_v17 = vmul.f32 -1.442695, %v1018_v14  ;;  %v1265_v23 = vmul.f32 -1.442695, %v1020_v21 }
 0x6ca   :  { %v974_v18 = vpop.f32.mrf.mxu0  ;;  %v1015_v19 = vpop.f32.mrf.mxu1 }
 0x6cb   :  { %1422 = vpow2.f32 %v1264_v17 }
 0x6cc   :  { %1424 = vpow2.f32 %v1265_v23 }
 0x6d6   :  { %v1421_v24 = vpop.eup %1420 }
 0x6d7   :  { %v1024_v26 = vadd.f32 1.0, %v1421_v24 }
 0x6d8   :  { %v1423_v27 = vpop.eup %1422 }
 0x6d9   :  { %1426 = vrcp.f32 %v1024_v26  ;;  %v1030_v28 = vadd.f32 1.0, %v1423_v27  ;;  %v1425_v29 = vpop.eup %1424 }
 0x6da   :  { %1428 = vtanh.f32 %v1019_v25  ;;  %v1037_v40 = vadd.f32 1.0, %v1425_v29 }
 0x6db   :  { %1430 = vrcp.f32 %v1030_v28 }
 0x6dc   :  { %1432 = vrcp.f32 %v1037_v40 }
 0x6e6   :  { %v1427_v31 = vpop.eup %1426 }
 0x6e7   :  { %v1429_v32 = vpop.eup %1428 }
 0x6e8   :  { %v1431_v34 = vpop.eup %1430  ;;  %v1041_v55 = vmul.f32 %v1429_v32, %v1427_v31 }
 0x6e9   :  { %v1040_v57 = vmul.f32 %v1431_v34, %v2037_v56  ;;  %v1433_v59 = vpop.eup %1432  ;;  %v1268_v56 = vld [vmem:[%s2174_s0 + $0xe8] sm:$0xff] }
 0x6eb   :  { %v1042_v58 = vadd.f32 %v1041_v55, %v1040_v57 }
 0x6ed   :  { %1434 = vtanh.f32 %v1042_v58 }
 0x6fa   :  { %v1435_v60 = vpop.eup %1434 }
 0x6fb   :  { %v1044_v61 = vmul.f32 %v1435_v60, %v1433_v59 }
 0x6fd   :  { %1266 = vst [vmem:[%s2176_s4 + $0x30] sm:$0xff] %v1044_v61  ;;  %v1052_v62 = vpack.c.bf16 %v1044_v61, %v1044_v61 }
 0x6ff   :  { %1086 = vmatmul.mubr.bf16.vlgmr.msra.gmra.mxu0 %v1052_v62  ;;  %1127 = vmatmul.mubr.bf16.vlgmr.msra.gmra.mxu1 %v1052_v62 }
 0x7bf   :  { %v1087_v6 = vpop.f32.mrf.mxu0  ;;  %v1128_v63 = vpop.f32.mrf.mxu1 }
 0x7c0   :  { %v1135_v30 = vadd.f32 %v1267_v0, %v1087_v6  ;;  %v1137_v49 = vadd.f32 %v1269_v46, %v1128_v63 }
 0x7c1   :  { %v1089_v33 = vpop.f32.mrf.mxu0  ;;  %v1130_v36 = vpop.f32.mrf.mxu1 }
 0x7c2   :  { %v1271_v1 = vmul.f32 -1.442695, %v1135_v30  ;;  %v1136_v37 = vadd.f32 %v1268_v56, %v1089_v33  ;;  %v1138_v45 = vadd.f32 %v1270_v44, %v1130_v36 }
 0x7c3   :  { %v1091_v38 = vpop.f32.mrf.mxu0  ;;  %v1132_v39 = vpop.f32.mrf.mxu1 }
 0x7c4   :  { %1436 = vpow2.f32 %v1271_v1  ;;  %v1272_v41 = vmul.f32 -1.442695, %v1136_v37  ;;  %v1273_v47 = vmul.f32 -1.442695, %v1138_v45 }
 0x7c5   :  { %v1092_v42 = vpop.f32.mrf.mxu0  ;;  %v1133_v43 = vpop.f32.mrf.mxu1 }
 0x7c6   :  { %1438 = vpow2.f32 %v1272_v41 }
 0x7c7   :  { %1440 = vpow2.f32 %v1273_v47 }
 0x7d1   :  { %v1437_v48 = vpop.eup %1436 }
 0x7d2   :  { %v1142_v50 = vadd.f32 1.0, %v1437_v48 }
 0x7d3   :  { %v1439_v51 = vpop.eup %1438 }
 0x7d4   :  { %1442 = vrcp.f32 %v1142_v50  ;;  %v1148_v52 = vadd.f32 1.0, %v1439_v51  ;;  %v1441_v35 = vpop.eup %1440 }
 0x7d5   :  { %1444 = vtanh.f32 %v1137_v49  ;;  %v1155_v3 = vadd.f32 1.0, %v1441_v35 }
 0x7d6   :  { %1446 = vrcp.f32 %v1148_v52 }
 0x7d7   :  { %1448 = vrcp.f32 %v1155_v3 }
 0x7e1   :  { %v1443_v53 = vpop.eup %1442 }
 0x7e2   :  { %v1445_v54 = vpop.eup %1444 }
 0x7e3   :  { %v1447_v2 = vpop.eup %1446  ;;  %v1159_v4 = vmul.f32 %v1445_v54, %v1443_v53 }
 0x7e4   :  { %v1158_v5 = vmul.f32 %v1447_v2, %v1042_v58  ;;  %v1449_v8 = vpop.eup %1448 }
 0x7e6   :  { %v1160_v7 = vadd.f32 %v1159_v4, %v1158_v5 }
 0x7e8   :  { %1450 = vtanh.f32 %v1160_v7  ;;  %1171 = vst [vmem:[%s2177_s6] sm:$0xff] %v1160_v7 }
 0x7f5   :  { %v1451_v9 = vpop.eup %1450 }
 0x7f6   :  { %v1162_v10 = vmul.f32 %v1451_v9, %v1449_v8 }
 0x7f8   :  { %1274 = vst [vmem:[%s2176_s4 + $0x38] sm:$0xff] %v1162_v10  ;;  %1170 = vst [vmem:[%s2178_s5] sm:$0xff] %v1162_v10 }

</bundles_post_ra>
